<compile_context>
chip_gen: v7x
topology: tpu7x:2x2x1
jax: 0.10.0
libtpu: 0.0.40
codegen_flags: <defaults>
</compile_context>

<pallas_src>
import functools

import jax
import jax.numpy as jnp
from jax.experimental import pallas as pl
from jax.experimental.pallas import tpu as pltpu

_VMEM_LIMIT_BYTES = 32 * 1024 * 1024   # within scoped default on v6e/v7x; raises v5e's 16 MiB
_FUSED_VMEM_BUDGET = 12 * 1024 * 1024  # conservative "keep z resident" threshold (v7x-safe)


def _round_up(x, m):
    return ((x + m - 1) // m) * m


def _pick_tile_n(n, md, mh, d, z_itemsize, budget_bytes=20 * 1024 * 1024):
    """Largest N-tile (multiple of 8, <=4096) whose padded working set fits VMEM."""
    md_p = max(128, _round_up(md, 128))
    mh_p = max(128, _round_up(mh, 128))
    d_p = max(128, _round_up(d, 128))
    # Resident weights (count double-buffered to be safe): W1_bd bf16, b1_bd, B_sel.
    fixed = 2 * (md_p * mh_p * 2 + mh_p * 4 + md_p * d_p * 4)
    per_row = (
        2 * md_p * z_itemsize   # double-buffered z tile (both passes)
        + md_p * 2              # in-kernel bf16 cast of the z tile (pass 1)
        + mh_p * 4              # (TN, M*H) tanh intermediate (pass 1)
        + 2 * d_p * 4           # double-buffered output tile (pass 2)
    )
    tn = max(budget_bytes - fixed, 0) // max(per_row, 1)
    tn = (tn // 8) * 8
    tn = max(8, min(4096, tn))
    return min(tn, _round_up(n, 8))


# --------------------------- two-pass streaming kernels -----------------------

def _project_partial_kernel(z_ref, w1bd_ref, b1bd_ref, part_ref):
    """Pass 1: per-tile sum over nodes of tanh(z @ W1_bd + b1_bd).

    z_ref: (TN, M*D)  w1bd_ref: (M*D, M*H) bf16  b1bd_ref: (1, M*H)  part_ref: (1, M*H)
    """
    h = jnp.tanh(
        jnp.dot(
            z_ref[...].astype(jnp.bfloat16),          # bf16 MXU operands, f32 accumulate
            w1bd_ref[...],
            preferred_element_type=jnp.float32,
        )
        + b1bd_ref[...]
    )                                                  # (TN, M*H) f32
    part_ref[...] = jnp.sum(h, axis=0, keepdims=True)  # node-sum; w2 applied in wrapper


def _weighted_sum_kernel(z_ref, bsel_ref, o_ref):
    """Pass 2: out_tile = z2d_tile @ B, B[m*D+d, d] = beta[m]  (pure HBM stream).

    z_ref: (TN, M*D)  bsel_ref: (M*D, D)  o_ref: (TN, D)
    """
    o_ref[...] = jnp.dot(
        z_ref[...].astype(jnp.float32),
        bsel_ref[...],
        preferred_element_type=jnp.float32,
        precision=jax.lax.Precision.HIGHEST,
    ).astype(o_ref.dtype)


# --------------------------- fused resident-z kernel --------------------------

def _fused_kernel(z_ref, w1bd_ref, b1bd_ref, w2e_ref, r_ref, o_ref, *, n_valid, n_pad):
    """Single kernel for small problems: z read from HBM exactly once.

    z_ref: (Np, M*D)  w1bd_ref: (M*D, M*H) bf16  b1bd_ref: (1, M*H)
    w2e_ref: (M*H, M*D)  (block-diag w2 broadcast over D columns)
    r_ref: (M*D, D)      (0/1 segment reducer)      o_ref: (Np, D)
    """
    z2 = z_ref[...].astype(jnp.float32)                               # (Np, M*D)
    h = jnp.tanh(
        jnp.dot(z2.astype(jnp.bfloat16), w1bd_ref[...],
                preferred_element_type=jnp.float32)
        + b1bd_ref[...]
    )                                                                 # (Np, M*H)
    h_sum = jnp.sum(h, axis=0, keepdims=True)                         # (1, M*H)
    if n_pad != n_valid:
        # Padded zero rows contribute exactly tanh(b1) per meta-path.
        h_sum = h_sum - jnp.float32(n_pad - n_valid) * jnp.tanh(b1bd_ref[...])
    logits_cols = jnp.dot(
        h_sum, w2e_ref[...],
        preferred_element_type=jnp.float32,
        precision=jax.lax.Precision.HIGHEST,
    ) * (1.0 / n_valid)                                               # (1, M*D), const per D-block
    beta_cols = jax.nn.sigmoid(logits_cols)                           # (1, M*D)
    o_ref[...] = jnp.dot(
        z2 * beta_cols, r_ref[...],
        preferred_element_type=jnp.float32,
        precision=jax.lax.Precision.HIGHEST,
    ).astype(o_ref.dtype)


# ------------------------------------ wrapper ---------------------------------

def semantic_attention(z, w1, b1, w2, *, tile_n=None, force_two_pass=False):
    """z: (N, M, D). w1: (D, H), b1: (H,), w2: (H, 1). Returns (N, D) float32."""
    N, M, D = z.shape
    H = w1.shape[1]
    MD, MH = M * D, M * H

    # Keep z bf16 end-to-end if supplied as bf16; never add a wrapper f32->bf16
    # cast of an f32 input (that would add an HBM pass and cancel the saving).
    stream_dtype = jnp.bfloat16 if z.dtype == jnp.bfloat16 else jnp.float32
    z2d = z.reshape(N, MD).astype(stream_dtype)       # free contiguous reshape -> lane-dense

    w1 = w1.astype(jnp.float32)
    b1 = b1.astype(jnp.float32)
    w2 = w2.astype(jnp.float32)

    eye_m = jnp.eye(M, dtype=jnp.float32)
    # Block-diagonal projection weights so pass 1 is a single lane-dense matmul.
    w1bd = jnp.kron(eye_m, w1).astype(jnp.bfloat16)                   # (M*D, M*H)
    b1bd = jnp.tile(b1, M).reshape(1, MH)                             # (1, M*H) f32 (exact)

    zit = jnp.dtype(stream_dtype).itemsize
    md_p = max(128, _round_up(MD, 128))
    mh_p = max(128, _round_up(MH, 128))
    d_p = max(128, _round_up(D, 128))

    # ---------------- fused single-kernel path (small problems) ---------------
    n_pad8 = _round_up(N, 8)
    fused_bytes = (
        n_pad8 * (md_p * zit + md_p * 2 + mh_p * 4 + md_p * 4 + d_p * 4)
        + md_p * mh_p * 2 + mh_p * md_p * 4 + md_p * d_p * 4 + mh_p * 4
    )
    if (not force_two_pass) and fused_bytes <= _FUSED_VMEM_BUDGET:
        z_f = z2d if n_pad8 == N else jnp.pad(z2d, ((0, n_pad8 - N), (0, 0)))
        # w2e[m*H+h, m'*D+d] = w2[h] if m == m' else 0  -> per-column logits.
        w2e = jnp.kron(eye_m, jnp.dot(w2, jnp.ones((1, D), jnp.float32)))   # (M*H, M*D)
        # r[m*D+d, d'] = 1 if d == d'  -> segment reducer over meta-paths.
        r = jnp.kron(jnp.ones((M, 1), jnp.float32), jnp.eye(D, dtype=jnp.float32))  # (M*D, D)
        out = pl.pallas_call(
            functools.partial(_fused_kernel, n_valid=N, n_pad=n_pad8),
            out_shape=jax.ShapeDtypeStruct((n_pad8, D), jnp.float32),
            compiler_params=pltpu.CompilerParams(vmem_limit_bytes=_VMEM_LIMIT_BYTES),
        )(z_f, w1bd, b1bd, w2e, r)
        return out[:N] if n_pad8 != N else out

    # --------------------------- two-pass streaming ---------------------------
    TN = tile_n if tile_n is not None else _pick_tile_n(N, MD, MH, D, zit)
    TN = max(8, (TN // 8) * 8)
    N_pad = _round_up(N, TN)
    z_p = z2d if N_pad == N else jnp.pad(z2d, ((0, N_pad - N), (0, 0)))
    num_tiles = N_pad // TN

    # Pass 1: per-tile node-sums of tanh(z W1 + b1), output lane-dense (1, M*H).
    partials = pl.pallas_call(
        _project_partial_kernel,
        out_shape=jax.ShapeDtypeStruct((num_tiles, 1, MH), jnp.float32),
        grid_spec=pltpu.PrefetchScalarGridSpec(
            num_scalar_prefetch=0,
            grid=(num_tiles,),
            in_specs=[
                pl.BlockSpec((TN, MD), lambda i: (i, 0)),     # z tile (lane-dense)
                pl.BlockSpec((MD, MH), lambda i: (0, 0)),     # W1_bd (resident, bf16)
                pl.BlockSpec((1, MH), lambda i: (0, 0)),      # b1_bd (resident)
            ],
            out_specs=pl.BlockSpec((None, 1, MH), lambda i: (i, 0, 0)),
        ),
        compiler_params=pltpu.CompilerParams(
            dimension_semantics=("parallel",),
            vmem_limit_bytes=_VMEM_LIMIT_BYTES,
        ),
    )(z_p, w1bd, b1bd)

    # Tiny finishing math (M is small) in plain JAX.
    h_sum = jnp.sum(partials[:, 0, :], axis=0)                        # (M*H,)
    pad_rows = N_pad - N
    if pad_rows:
        # No in-kernel mask: padded zero rows contribute exactly tanh(b1).
        h_sum = h_sum - jnp.float32(pad_rows) * jnp.tanh(b1bd[0])
    logits = jnp.dot(h_sum.reshape(M, H), w2)[:, 0] / jnp.float32(N)  # (M,) == project(z).mean(0)
    beta = jax.nn.sigmoid(logits)                                     # (M,)

    # Pass 2: out = z2d @ B with B[m*D+d, d] = beta[m]  (beta-selection matmul).
    bsel = jnp.kron(beta.reshape(M, 1), jnp.eye(D, dtype=jnp.float32))  # (M*D, D)
    out = pl.pallas_call(
        _weighted_sum_kernel,
        out_shape=jax.ShapeDtypeStruct((N_pad, D), jnp.float32),
        grid_spec=pltpu.PrefetchScalarGridSpec(
            num_scalar_prefetch=0,
            grid=(num_tiles,),
            in_specs=[
                pl.BlockSpec((TN, MD), lambda i: (i, 0)),     # z tile
                pl.BlockSpec((MD, D), lambda i: (0, 0)),      # beta-selection matrix (resident)
            ],
            out_specs=pl.BlockSpec((TN, D), lambda i: (i, 0)),
        ),
        compiler_params=pltpu.CompilerParams(
            dimension_semantics=("parallel",),
            vmem_limit_bytes=_VMEM_LIMIT_BYTES,
        ),
    )(z_p, bsel)

    return out[:N] if N_pad != N else out


def semantic_attention_ref(z, w1, b1, w2):
    """Plain-JAX reference mirroring the PyTorch forward exactly (f32)."""
    s = jnp.tanh(jnp.einsum("nmd,dh->nmh", z, w1) + b1)          # (N, M, H)
    w = jnp.einsum("nmh,ho->nmo", s, w2).mean(axis=0)            # (M, 1)
    beta = jax.nn.sigmoid(w)                                     # (M, 1)
    beta = jnp.broadcast_to(beta, (z.shape[0],) + beta.shape)    # (N, M, 1)
    return (beta * z).sum(axis=1)                                # (N, D)


if __name__ == "__main__":
    # Small shapes consistent with the module: N nodes, M meta-paths, in_size D, hidden H.
    N, M, D, H = 8, 4, 32, 128

    key = jax.random.PRNGKey(0)
    kz, kw1, kb1, kw2, kz2 = jax.random.split(key, 5)

    z = jax.random.normal(kz, (N, M, D), dtype=jnp.float32)

    # Deterministic parameter init (nn.Linear-style uniform bounds).
    lim1 = 1.0 / (D ** 0.5)
    w1 = jax.random.uniform(kw1, (D, H), jnp.float32, -lim1, lim1)   # Linear(D,H).weight.T
    b1 = jax.random.uniform(kb1, (H,), jnp.float32, -lim1, lim1)     # Linear(D,H).bias
    lim2 = 1.0 / (H ** 0.5)
    w2 = jax.random.uniform(kw2, (H, 1), jnp.float32, -lim2, lim2)   # Linear(H,1,bias=False).weight.T

    # 1) Fused resident-z path (chosen automatically at this small size).
    ref = jax.block_until_ready(semantic_attention_ref(z, w1, b1, w2))
    out = jax.block_until_ready(semantic_attention(z, w1, b1, w2))
    assert out.shape == (N, D), out.shape
    err = float(jnp.max(jnp.abs(out - ref)))
    # bf16 MXU operands in the projection -> slightly relaxed tolerance vs f32 ref.
    assert jnp.allclose(out, ref, atol=1e-2, rtol=1e-2), err

    # 2) Two-pass streaming path (forced), small N-tile to exercise multi-tile + padding.
    N2 = 50
    z2 = jax.random.normal(kz2, (N2, M, D), dtype=jnp.float32)
    ref2 = jax.block_until_ready(semantic_attention_ref(z2, w1, b1, w2))
    out2 = jax.block_until_ready(
        semantic_attention(z2, w1, b1, w2, force_two_pass=True, tile_n=16))
    assert out2.shape == (N2, D), out2.shape
    err2 = float(jnp.max(jnp.abs(out2 - ref2)))
    assert jnp.allclose(out2, ref2, atol=1e-2, rtol=1e-2), err2

    print("KERNEL_OK")
</pallas_src>

<mosaic_0001>
module attributes {stable_mosaic.version = 11 : i64} {
  func.func @_fused_kernel(%arg0: memref<8x128xf32, #tpu.memory_space<vmem>>, %arg1: memref<128x512xbf16, #tpu.memory_space<vmem>>, %arg2: memref<1x512xf32, #tpu.memory_space<vmem>>, %arg3: memref<512x128xf32, #tpu.memory_space<vmem>>, %arg4: memref<128x32xf32, #tpu.memory_space<vmem>>, %arg5: memref<8x32xf32, #tpu.memory_space<vmem>>) attributes {dimension_semantics = [], scalar_prefetch = 0 : i64, scratch_operands = 0 : i64, tpu.core_type = #tpu.core_type<tc>} {
    %c0 = arith.constant 0 : index
    %c0_0 = arith.constant 0 : index
    %0 = vector.load %arg0[%c0, %c0_0] : memref<8x128xf32, #tpu.memory_space<vmem>>, vector<8x128xf32>
    %1 = arith.truncf %0 : vector<8x128xf32> to vector<8x128xbf16>
    %c0_1 = arith.constant 0 : index
    %c0_2 = arith.constant 0 : index
    %2 = vector.load %arg1[%c0_1, %c0_2] : memref<128x512xbf16, #tpu.memory_space<vmem>>, vector<128x512xbf16>
    %cst = arith.constant dense<0.000000e+00> : vector<8x512xf32>
    %3 = tpu.matmul %1, %2, %cst {dimension_numbers = #tpu.dot_dimension_numbers<[1], [0], [0], [1], [0, 0, 1, 1], [], []>} : vector<8x128xbf16>, vector<128x512xbf16>, vector<8x512xf32> -> vector<8x512xf32>
    %c0_3 = arith.constant 0 : index
    %c0_4 = arith.constant 0 : index
    %4 = vector.load %arg2[%c0_3, %c0_4] : memref<1x512xf32, #tpu.memory_space<vmem>>, vector<1x512xf32>
    %5 = vector.broadcast %4 : vector<1x512xf32> to vector<8x512xf32>
    %6 = arith.addf %3, %5 : vector<8x512xf32>
    %7 = math.tanh %6 : vector<8x512xf32>
    %cst_5 = arith.constant dense<0.000000e+00> : vector<512xf32>
    %8 = vector.multi_reduction <add>, %7, %cst_5 [0] : vector<8x512xf32> to vector<512xf32>
    %9 = vector.shape_cast %8 : vector<512xf32> to vector<1x512xf32>
    %c0_6 = arith.constant 0 : index
    %c0_7 = arith.constant 0 : index
    %10 = vector.load %arg3[%c0_6, %c0_7] : memref<512x128xf32, #tpu.memory_space<vmem>>, vector<512x128xf32>
    %cst_8 = arith.constant dense<0.000000e+00> : vector<1x128xf32>
    %11 = tpu.matmul %9, %10, %cst_8 {dimension_numbers = #tpu.dot_dimension_numbers<[1], [0], [0], [1], [0, 0, 1, 1], [], []>, precision = #tpu.contract_precision<fp32>} : vector<1x512xf32>, vector<512x128xf32>, vector<1x128xf32> -> vector<1x128xf32>
    %cst_9 = arith.constant 1.250000e-01 : f32
    %12 = vector.broadcast %cst_9 : f32 to vector<1x128xf32>
    %13 = arith.mulf %11, %12 : vector<1x128xf32>
    %14 = arith.negf %13 : vector<1x128xf32>
    %15 = math.exp %14 : vector<1x128xf32>
    %cst_10 = arith.constant 1.000000e+00 : f32
    %16 = vector.broadcast %cst_10 : f32 to vector<1x128xf32>
    %17 = arith.addf %16, %15 : vector<1x128xf32>
    %18 = arith.divf %16, %17 : vector<1x128xf32>
    %19 = vector.broadcast %18 : vector<1x128xf32> to vector<8x128xf32>
    %20 = arith.mulf %0, %19 : vector<8x128xf32>
    %c0_11 = arith.constant 0 : index
    %c0_12 = arith.constant 0 : index
    %21 = vector.load %arg4[%c0_11, %c0_12] : memref<128x32xf32, #tpu.memory_space<vmem>>, vector<128x32xf32>
    %cst_13 = arith.constant dense<0.000000e+00> : vector<8x32xf32>
    %22 = tpu.matmul %20, %21, %cst_13 {dimension_numbers = #tpu.dot_dimension_numbers<[1], [0], [0], [1], [0, 0, 1, 1], [], []>, precision = #tpu.contract_precision<fp32>} : vector<8x128xf32>, vector<128x32xf32>, vector<8x32xf32> -> vector<8x32xf32>
    %c0_14 = arith.constant 0 : index
    %c0_15 = arith.constant 0 : index
    %23 = vector.load %arg5[%c0_14, %c0_15] : memref<8x32xf32, #tpu.memory_space<vmem>>, vector<8x32xf32>
    tpu.vector_store %arg5[%c0_14, %c0_15], %22 {strides = array<i32>} : memref<8x32xf32, #tpu.memory_space<vmem>>, vector<8x32xf32>,
    return
  }
}

</mosaic_0001>

<bundles_post_ra>
// kernel: tpu_custom_call.1
= control target key start
LH: loop header
LB: loop body
LE: loop exit
PB: predicated region body
PF: predicated region fallthrough
CT: control target
= control target key end

     0   :  { %10 = vsyncpa [#allocation3], 0  ;;  %s5736_s0 = inlined_call_operand.vmem [shape: f32[8,128], index: 0, kind: input, shape index: {}]   ;;  %s5737_s1 = inlined_call_operand.hbm [shape: bf16[128,512], index: 1, kind: input, shape index: {}]   ;;  %s5738_s2 = inlined_call_operand.vmem [shape: f32[1,512], index: 2, kind: input, shape index: {}]   ;;  %s5739_s3 = inlined_call_operand.hbm [shape: f32[512,128], index: 3, kind: input, shape index: {}]   ;;  %s5740_s4 = inlined_call_operand.vmem [shape: f32[128,32], index: 4, kind: input, shape index: {}]   ;;  %s5741_s5 = inlined_call_operand.hbm [shape: f32[8,32], index: 5, kind: output, shape index: {}]  }
   0x1   :  { %11 = vsyncpa [#allocation6], 0 }
   0x2   :  { %12 = vsyncpa [#allocation4], 0  ;;  %s4298_s18 = smov [#allocation2]   ;;  %s4226_s22 = scalar_lea.hbm %s5737_s1, 4096 }
   0x3   :  { %s20_s19 = sshll.u32 %s4298_s18, 4  ;;  %p4227_p0 = scmp.ne.s32.totalorder %s5737_s1, %s4226_s22  ;;  %s21_s19 = int_to_ptr.vmem [resolvable:$true] %s20_s19 }
   0x4   :  { %p4230_p1 = scmp.lt.u32.totalorder %s4226_s22, %s5737_s1 }
   0x6   :  { %p4232_p2 = pnand %p4230_p1, %p4227_p0 }
   0x8   :  { %4235 = shalt.err (!%p4232_p2)
}
   0x9   :  { %s4236_s27 = scalar_lea.vmem %s21_s19, 4096  ;;  %p4241_p4 = scmp.lt.s32.totalorder %s21_s19, %s21_s19 }
   0xa   :  { %p4237_p3 = scmp.ne.s32.totalorder %s21_s19, %s4236_s27  ;;  %p4242_p5 = scmp.lt.s32.totalorder %s4236_s27, %s4236_s27 }
   0xc   :  { %p4243_p6 = por %p4242_p5, %p4241_p4 }
   0xe   :  { %p4244_p7 = pnand %p4243_p6, %p4237_p3 }
  0x10   :  { %4247 = shalt.err (!%p4244_p7)
}
  0x11   :  { %s4299_s28 = smov 256   ;;  %s4300_s29 = smov 16  }
  0x12   :  { %26 = dma.hbm_to_vmem [thread:$0]  %s5737_s1, 4096, %s21_s19, [#allocation3], %s4299_s28, %s4299_s28, %s4300_s29  }
  0x13   :  { %s4301_s7 = smov [#allocation5]   ;;  %s4248_s11 = scalar_lea.hbm %s5739_s3, 8192 }
  0x14   :  { %s34_s8 = sshll.u32 %s4301_s7, 4  ;;  %p4249_p8 = scmp.ne.s32.totalorder %s5739_s3, %s4248_s11  ;;  %s35_s8 = int_to_ptr.vmem [resolvable:$true] %s34_s8 }
  0x15   :  { %p4252_p9 = scmp.lt.u32.totalorder %s4248_s11, %s5739_s3 }
  0x17   :  { %p4254_p10 = pnand %p4252_p9, %p4249_p8 }
  0x19   :  { %4257 = shalt.err (!%p4254_p10)
}
  0x1a   :  { %s4258_s16 = scalar_lea.vmem %s35_s8, 8192  ;;  %p4263_p12 = scmp.lt.s32.totalorder %s35_s8, %s35_s8 }
  0x1b   :  { %p4259_p11 = scmp.ne.s32.totalorder %s35_s8, %s4258_s16  ;;  %p4264_p13 = scmp.lt.s32.totalorder %s4258_s16, %s4258_s16 }
  0x1d   :  { %p4265_p0 = por %p4264_p13, %p4263_p12 }
  0x1f   :  { %p4266_p1 = pnand %p4265_p0, %p4259_p11 }
  0x21   :  { %4269 = shalt.err (!%p4266_p1)
}
  0x22   :  { %s4302_s1 = smov 128   ;;  %s4303_s17 = smov 8  }
  0x23   :  { %40 = dma.hbm_to_vmem [thread:$0]  %s5739_s3, 8192, %s35_s8, [#allocation6], %s4302_s1, %s4302_s1, %s4303_s17  }
  0x24   :  { %4292 = dma.done.wait [#allocation3], 4096  }
  0x25   :  { %4293 = vsyncadd [#allocation3], 4294963200 }
  0x26   :  { %4294 = dma.done.wait [#allocation6], 8192  }
  0x27   :  { %4295 = vsyncadd [#allocation6], 4294959104  ;;  %v4304_v0 = vmov 0   ;;  %v4165_v1 = vld [vmem:[#allocation2 + $0x4] ss:$16 sps:$4 sm:$0xff]   ;;  %v4365_v15 = vld [vmem:[#allocation5 + $0x88] sm:$0xff] }
  0x28   :  { %298 = vmatprep.mubr.bf16.mxu1 %v4304_v0  ;;  %v4167_v2 = vld [vmem:[#allocation2] ss:$16 sps:$4 sm:$0xff]   ;;  %266 = vmatprep.subr.bf16.mxu1 %v4165_v1  ;;  %v4168_v3 = vld [vmem:[#allocation2 + $0x24] ss:$16 sps:$4 sm:$0xff]   ;;  %v4370_v18 = vld [vmem:[#allocation5 + $0x8] sm:$0xff]  ;;  %v492_v20 = vand.u32 4294901760, %v4365_v15 }
  0x29   :  { %267 = vmatpush1.bf16.msra.mxu1 %v4167_v2  ;;  %v4170_v4 = vld [vmem:[#allocation2 + $0x20] ss:$16 sps:$4 sm:$0xff]   ;;  %v4171_v5 = vld [vmem:[#allocation2 + $0x44] ss:$16 sps:$4 sm:$0xff]   ;;  %v444_v22 = vand.u32 4294901760, %v4370_v18  ;;  %v395_v54 = vld [vmem:[#allocation5 + $0x98] sm:$0xff] }
  0x2a   :  { %268 = vmatprep.subr.bf16.mxu1 %v4168_v3  ;;  %v4173_v6 = vld [vmem:[#allocation2 + $0x40] ss:$16 sps:$4 sm:$0xff]   ;;  %v4174_v7 = vld [vmem:[#allocation2 + $0x64] ss:$16 sps:$4 sm:$0xff]   ;;  %v4383_v25 = vsub.f32 %v4365_v15, %v492_v20  ;;  %v4191_v34 = vld [vmem:[#allocation2 + $0xc] ss:$16 sps:$4 sm:$0xff]  }
  0x2b   :  { %v4176_v8 = vld [vmem:[#allocation2 + $0x60] ss:$16 sps:$4 sm:$0xff]   ;;  %v4177_v9 = vld [vmem:[#allocation2 + $0x84] ss:$16 sps:$4 sm:$0xff]   ;;  %v4393_v27 = vsub.f32 %v4370_v18, %v444_v22  ;;  %v4189_v38 = vld [vmem:[#allocation2 + $0x8] ss:$16 sps:$4 sm:$0xff]  }
  0x2c   :  { %v4179_v10 = vld [vmem:[#allocation2 + $0x80] ss:$16 sps:$4 sm:$0xff]   ;;  %v4180_v11 = vld [vmem:[#allocation2 + $0xa4] ss:$16 sps:$4 sm:$0xff]   ;;  %5880 = vst [vmem:[#allocation12_spill] sm:$0xff] %v4383_v25  ;;  %v674_v31 = vand.u32 4294901760, %v4383_v25 }
  0x2d   :  { %269 = vmatpush1.bf16.msra.mxu1 %v4170_v4  ;;  %v4182_v12 = vld [vmem:[#allocation2 + $0xa0] ss:$16 sps:$4 sm:$0xff]   ;;  %v4183_v13 = vld [vmem:[#allocation2 + $0xc4] ss:$16 sps:$4 sm:$0xff]   ;;  %5882 = vst [vmem:[#allocation14_spill] sm:$0xff] %v4393_v27  ;;  %v562_v33 = vand.u32 4294901760, %v4393_v27 }
  0x2e   :  { %270 = vmatprep.subr.bf16.mxu1 %v4171_v5  ;;  %v4363_v14 = vld [vmem:[#allocation5 + $0x80] sm:$0xff]  ;;  %v4194_v39 = vld [vmem:[#allocation2 + $0x2c] ss:$16 sps:$4 sm:$0xff]   ;;  %v4192_v40 = vld [vmem:[#allocation2 + $0x28] ss:$16 sps:$4 sm:$0xff]   ;;  %v498_v56 = vand.u32 4294901760, %v395_v54 }
  0x2f   :  { %v489_v16 = vand.u32 4294901760, %v4363_v14  ;;  %v4368_v17 = vld [vmem:[#allocation5] sm:$0xff]  ;;  %v4197_v41 = vld [vmem:[#allocation2 + $0x4c] ss:$16 sps:$4 sm:$0xff]   ;;  %v4195_v42 = vld [vmem:[#allocation2 + $0x48] ss:$16 sps:$4 sm:$0xff]  }
  0x30   :  { %v4185_v19 = vld [vmem:[#allocation2 + $0xc0] ss:$16 sps:$4 sm:$0xff]   ;;  %v441_v21 = vand.u32 4294901760, %v4368_v17  ;;  %v4186_v23 = vld [vmem:[#allocation2 + $0xe4] ss:$16 sps:$4 sm:$0xff]   ;;  %v379_v58 = vld [vmem:[#allocation5 + $0x18] sm:$0xff]  ;;  %v4415_v62 = vsub.f32 %v395_v54, %v498_v56 }
  0x31   :  { %271 = vmatpush1.bf16.msra.mxu1 %v4173_v6  ;;  %v4378_v24 = vsub.f32 %v4363_v14, %v489_v16  ;;  %v4188_v29 = vld [vmem:[#allocation2 + $0xe0] ss:$16 sps:$4 sm:$0xff]   ;;  %v4200_v43 = vld [vmem:[#allocation2 + $0x6c] ss:$16 sps:$4 sm:$0xff]   ;;  %v4198_v44 = vld [vmem:[#allocation2 + $0x68] ss:$16 sps:$4 sm:$0xff]  }
  0x32   :  { %272 = vmatprep.subr.bf16.mxu1 %v4174_v7  ;;  %v4388_v26 = vsub.f32 %v4368_v17, %v441_v21  ;;  %v50_v30 = vld [vmem:[%s5736_s0] sm:$0xff]  ;;  %v4203_v45 = vld [vmem:[#allocation2 + $0x8c] ss:$16 sps:$4 sm:$0xff]   ;;  %v4201_v46 = vld [vmem:[#allocation2 + $0x88] ss:$16 sps:$4 sm:$0xff]   ;;  %v450_v60 = vand.u32 4294901760, %v379_v58 }
  0x33   :  { %5879 = vst [vmem:[#allocation11_spill] sm:$0xff] %v4378_v24  ;;  %v667_v28 = vand.u32 4294901760, %v4378_v24  ;;  %v51_v36 = vpack.c.bf16 %v50_v30, %v50_v30  ;;  %v4206_v47 = vld [vmem:[#allocation2 + $0xac] ss:$16 sps:$4 sm:$0xff]   ;;  %v4204_v48 = vld [vmem:[#allocation2 + $0xa8] ss:$16 sps:$4 sm:$0xff]  }
  0x34   :  { %5881 = vst [vmem:[#allocation13_spill] sm:$0xff] %v4388_v26  ;;  %v555_v32 = vand.u32 4294901760, %v4388_v26  ;;  %v4209_v49 = vld [vmem:[#allocation2 + $0xcc] ss:$16 sps:$4 sm:$0xff]   ;;  %v4207_v50 = vld [vmem:[#allocation2 + $0xc8] ss:$16 sps:$4 sm:$0xff]  }
  0x35   :  { %273 = vmatpush1.bf16.msra.mxu1 %v4176_v8  ;;  %v3744_v35 = vpack.c.bf16 %v674_v31, %v667_v28  ;;  %v4212_v51 = vld [vmem:[#allocation2 + $0xec] ss:$16 sps:$4 sm:$0xff]   ;;  %v4210_v52 = vld [vmem:[#allocation2 + $0xe8] ss:$16 sps:$4 sm:$0xff]   ;;  %v394_v53 = vld [vmem:[#allocation5 + $0x90] sm:$0xff]  ;;  %5884 = vst [vmem:[#allocation16_spill] sm:$0xff] %v4415_v62 }
  0x36   :  { %274 = vmatprep.subr.bf16.mxu1 %v4177_v9  ;;  %v3746_v37 = vpack.c.bf16 %v562_v33, %v555_v32  ;;  %v495_v55 = vand.u32 4294901760, %v394_v53  ;;  %v4410_v57 = vld [vmem:[#allocation5 + $0x10] sm:$0xff]  ;;  %v4422_v1 = vld [vmem:[#allocation5 + $0xa0] sm:$0xff]  ;;  %v4424_v2 = vld [vmem:[#allocation5 + $0xa8] sm:$0xff]  ;;  %v5746_v4 = vand.u32 4294901760, %v4415_v62  ;;  %vm4306_vm0 = vmmov 0  }
  0x37   :  { %3745 = vmatprep.subr.bf16.mxu0 %v3744_v35  ;;  %v447_v59 = vand.u32 4294901760, %v4410_v57  ;;  %v501_v5 = vand.u32 4294901760, %v4422_v1  ;;  %v4429_v6 = vld [vmem:[#allocation5 + $0x20] sm:$0xff]  ;;  %v4431_v7 = vld [vmem:[#allocation5 + $0x28] sm:$0xff]  ;;  %v4463_v35 = vld [vmem:[#allocation5 + $0xb8] sm:$0xff]  ;;  %vm2833_vm1 = vcmask 261120  }
  0x38   :  { %3747 = vmatpush3.bf16.msra.mxu0 %v3746_v37  ;;  %v4413_v61 = vsub.f32 %v394_v53, %v495_v55  ;;  %v4530_v53 = vpack.c.bf16 %v498_v56, %v495_v55 }
  0x39   :  { %275 = vmatpush1.bf16.msra.mxu1 %v4179_v10  ;;  %v4418_v63 = vsub.f32 %v4410_v57, %v447_v59  ;;  %v504_v10 = vand.u32 4294901760, %v4424_v2 }
  0x3a   :  { %276 = vmatprep.subr.bf16.mxu1 %v4180_v11  ;;  %5883 = vst [vmem:[#allocation15_spill] sm:$0xff] %v4413_v61  ;;  %v5747_v3 = vand.u32 4294901760, %v4413_v61  ;;  %v453_v11 = vand.u32 4294901760, %v4429_v6  ;;  %5896 = vst [vmem:[#allocation28_spill] sm:$0xff] %v4530_v53 }
  0x3b   :  { %5885 = vst [vmem:[#allocation17_spill] sm:$0xff] %v4418_v63  ;;  %v5755_v8 = vand.u32 4294901760, %v4418_v63 }
  0x3c   :  { %v4459_v30 = vsub.f32 %v4429_v6, %v453_v11 }
  0x3d   :  { %277 = vmatpush1.bf16.msra.mxu1 %v4182_v12  ;;  %v3748_v12 = vpack.c.bf16 %v5746_v4, %v5747_v3  ;;  %v386_v4 = vld [vmem:[#allocation5 + $0x50] sm:$0xff]  ;;  %v387_v3 = vld [vmem:[#allocation5 + $0x58] sm:$0xff] }
  0x3e   :  { %278 = vmatprep.subr.bf16.mxu1 %v4183_v13  ;;  %v4444_v13 = vsub.f32 %v4422_v1, %v501_v5  ;;  %5889 = vst [vmem:[#allocation21_spill] sm:$0xff] %v4459_v30  ;;  %v471_v6 = vand.u32 4294901760, %v386_v4 }
  0x3f   :  { %3749 = vmatprep.subr.bf16.mxu0 %v3748_v12  ;;  %v4537_v12 = vpack.c.bf16 %v450_v60, %v447_v59 }
  0x40   :  { %5887 = vst [vmem:[#allocation19_spill] sm:$0xff] %v4444_v13 }
  0x41   :  { %279 = vmatpush1.bf16.msra.mxu1 %v4185_v19  ;;  %v456_v19 = vand.u32 4294901760, %v4431_v7  ;;  %5898 = vst [vmem:[#allocation30_spill] sm:$0xff] %v4537_v12 }
  0x42   :  { %280 = vmatprep.subr.bf16.mxu1 %v4186_v23 }
  0x43   :  { %v4469_v37 = vsub.f32 %v4431_v7, %v456_v19  ;;  %v474_v7 = vand.u32 4294901760, %v387_v3 }
  0x45   :  { %281 = vmatpush1.bf16.msra.mxu1 %v4188_v29  ;;  %v4454_v29 = vsub.f32 %v4424_v2, %v504_v10  ;;  %5890 = vst [vmem:[#allocation22_spill] sm:$0xff] %v4469_v37 }
  0x46   :  { %307 = vmatprep.subr.bf16.mxu1 %v4191_v34  ;;  %v4461_v34 = vld [vmem:[#allocation5 + $0xb0] sm:$0xff] }
  0x47   :  { %5888 = vst [vmem:[#allocation20_spill] sm:$0xff] %v4454_v29 }
  0x48   :  { %299 = vmatmul.mubr.bf16.vlgmr.msra.gmra.mrb[0].mxu1 %v51_v36 }
  0x49   :  { %308 = vmatpush1.bf16.msra.mxu1 %v4189_v38  ;;  %339 = vmatprep.mubr.bf16.mxu1 %v4304_v0  ;;  %v4420_v0 = vsub.f32 %v379_v58, %v450_v60  ;;  %v507_v38 = vand.u32 4294901760, %v4461_v34  ;;  %v402_v60 = vld [vmem:[#allocation5 + $0xd0] sm:$0xff] }
  0x4a   :  { %309 = vmatprep.subr.bf16.mxu1 %v4194_v39  ;;  %v510_v39 = vand.u32 4294901760, %v4463_v35 }
  0x4b   :  { %5886 = vst [vmem:[#allocation18_spill] sm:$0xff] %v4420_v0  ;;  %v5750_v9 = vand.u32 4294901760, %v4420_v0  ;;  %v4496_v14 = vsub.f32 %v4461_v34, %v507_v38 }
  0x4c   :  { %v4501_v15 = vsub.f32 %v4463_v35, %v510_v39 }
  0x4d   :  { %310 = vmatpush1.bf16.msra.mxu1 %v4192_v40  ;;  %v3750_v23 = vpack.c.bf16 %v5750_v9, %v5755_v8  ;;  %v4473_v40 = vld [vmem:[#allocation5 + $0x30] sm:$0xff]  ;;  %5893 = vst [vmem:[#allocation25_spill] sm:$0xff] %v4496_v14  ;;  %v4614_v8 = vsub.f32 %v387_v3, %v474_v7 }
  0x4e   :  { %311 = vmatprep.subr.bf16.mxu1 %v4197_v41  ;;  %v4475_v41 = vld [vmem:[#allocation5 + $0x38] sm:$0xff]  ;;  %5894 = vst [vmem:[#allocation26_spill] sm:$0xff] %v4501_v15 }
  0x4f   :  { %3751 = vmatpush3.bf16.msra.mxu0 %v3750_v23  ;;  %v462_v17 = vand.u32 4294901760, %v4475_v41  ;;  %5910 = vst [vmem:[#allocation42_spill] sm:$0xff] %v4614_v8 }
  0x51   :  { %312 = vmatpush1.bf16.msra.mxu1 %v4195_v42  ;;  %v4481_v42 = vpack.c.bf16 %v492_v20, %v489_v16  ;;  %v4514_v20 = vld [vmem:[#allocation5 + $0xc0] sm:$0xff]  ;;  %v4534_v57 = vsub.f32 %v4475_v41, %v462_v17 }
  0x52   :  { %313 = vmatprep.subr.bf16.mxu1 %v4200_v43  ;;  %v5744_v43 = vand.u32 4294901760, %v4454_v29 }
  0x53   :  { %5891 = vst [vmem:[#allocation23_spill] sm:$0xff] %v4481_v42  ;;  %5897 = vst [vmem:[#allocation29_spill] sm:$0xff] %v4534_v57  ;;  %v5751_v41 = vand.u32 4294901760, %v4534_v57 }
  0x55   :  { %314 = vmatpush1.bf16.msra.mxu1 %v4198_v44  ;;  %v5749_v44 = vand.u32 4294901760, %v4459_v30 }
  0x56   :  { %315 = vmatprep.subr.bf16.mxu1 %v4203_v45  ;;  %v459_v45 = vand.u32 4294901760, %v4473_v40 }
  0x58   :  { %v4512_v18 = vsub.f32 %v4473_v40, %v459_v45 }
  0x59   :  { %316 = vmatpush1.bf16.msra.mxu1 %v4201_v46  ;;  %v4490_v46 = vpack.c.bf16 %v444_v22, %v441_v21  ;;  %v4516_v21 = vld [vmem:[#allocation5 + $0xc8] sm:$0xff] }
  0x5a   :  { %317 = vmatprep.subr.bf16.mxu1 %v4206_v47  ;;  %v5748_v47 = vand.u32 4294901760, %v4469_v37  ;;  %5895 = vst [vmem:[#allocation27_spill] sm:$0xff] %v4512_v18  ;;  %v5754_v54 = vand.u32 4294901760, %v4512_v18  ;;  %v516_v58 = vand.u32 4294901760, %v4516_v21 }
  0x5b   :  { %5892 = vst [vmem:[#allocation24_spill] sm:$0xff] %v4490_v46 }
  0x5c   :  { %v3754_v22 = vpack.c.bf16 %v5748_v47, %v5749_v44  ;;  %v4568_v47 = vpack.c.bf16 %v504_v10, %v501_v5  ;;  %v4578_v44 = vpack.c.bf16 %v456_v19, %v453_v11  ;;  %v404_v10 = vld [vmem:[#allocation5 + $0xe0] sm:$0xff]  ;;  %v405_v11 = vld [vmem:[#allocation5 + $0xe8] sm:$0xff] }
  0x5d   :  { %318 = vmatpush1.bf16.msra.mxu1 %v4204_v48  ;;  %v5743_v48 = vand.u32 4294901760, %v4496_v14 }
  0x5e   :  { %319 = vmatprep.subr.bf16.mxu1 %v4209_v49  ;;  %v5742_v49 = vand.u32 4294901760, %v4501_v15  ;;  %5902 = vst [vmem:[#allocation34_spill] sm:$0xff] %v4568_v47  ;;  %5904 = vst [vmem:[#allocation36_spill] sm:$0xff] %v4578_v44 }
  0x60   :  { %v3756_v23 = vpack.c.bf16 %v5742_v49, %v5743_v48 }
  0x61   :  { %320 = vmatpush1.bf16.msra.mxu1 %v4207_v50  ;;  %v513_v50 = vand.u32 4294901760, %v4514_v20 }
  0x62   :  { %321 = vmatprep.subr.bf16.mxu1 %v4212_v51  ;;  %v4526_v51 = vld [vmem:[#allocation5 + $0x40] sm:$0xff] }
  0x63   :  { %v4546_v55 = vsub.f32 %v4514_v20, %v513_v50  ;;  %v465_v56 = vand.u32 4294901760, %v4526_v51 }
  0x65   :  { %322 = vmatpush1.bf16.msra.mxu1 %v4210_v52  ;;  %v4528_v52 = vld [vmem:[#allocation5 + $0x48] sm:$0xff]  ;;  %5899 = vst [vmem:[#allocation31_spill] sm:$0xff] %v4546_v55  ;;  %v5753_v49 = vand.u32 4294901760, %v4546_v55  ;;  %v4558_v48 = vsub.f32 %v4526_v51, %v465_v56 }
  0x66   :  { %3617 = vmatprep.subr.bf16.mxu1 %v4481_v42  ;;  %v468_v59 = vand.u32 4294901760, %v4528_v52  ;;  %v426_v42 = vld [vmem:[#allocation5 + $0x190] sm:$0xff] }
  0x67   :  { %5901 = vst [vmem:[#allocation33_spill] sm:$0xff] %v4558_v48  ;;  %v5759_v9 = vand.u32 4294901760, %v4558_v48 }
  0x68   :  { %340 = vmatmul.mubr.bf16.vlgmr.msra.gmra.mrb[4].mxu1 %v51_v36  ;;  %v5745_v36 = vand.u32 4294901760, %v4444_v13  ;;  %v4572_v51 = vsub.f32 %v4528_v52, %v468_v59  ;;  %v4628_v3 = vpack.c.bf16 %v468_v59, %v465_v56 }
  0x69   :  { %3619 = vmatpush3.bf16.msra.mxu1 %v4490_v46 }
  0x6a   :  { %v3752_v16 = vpack.c.bf16 %v5744_v43, %v5745_v36  ;;  %3621 = vmatprep.subr.bf16.mxu1 %v4530_v53  ;;  %v519_v43 = vand.u32 4294901760, %v402_v60  ;;  %5903 = vst [vmem:[#allocation35_spill] sm:$0xff] %v4572_v51  ;;  %v5758_v5 = vand.u32 4294901760, %v4572_v51  ;;  %5914 = vst [vmem:[#allocation46_spill] sm:$0xff] %v4628_v3 }
  0x6c   :  { %3753 = vmatprep.subr.bf16.mxu0 %v3752_v16  ;;  %v4552_v16 = vsub.f32 %v4516_v21, %v516_v58  ;;  %v3758_v21 = vpack.c.bf16 %v5751_v41, %v5754_v54  ;;  %v4581_v41 = vsub.f32 %v402_v60, %v519_v43  ;;  %v525_v60 = vand.u32 4294901760, %v404_v10 }
  0x6d   :  { %3755 = vmatpush3.bf16.msra.mxu0 %v3754_v22  ;;  %v403_v22 = vld [vmem:[#allocation5 + $0xd8] sm:$0xff]  ;;  %3623 = vmatpush3.bf16.msra.mxu1 %v4537_v12  ;;  %v4612_v54 = vsub.f32 %v386_v4, %v471_v6  ;;  %v4626_v4 = vpack.c.bf16 %v516_v58, %v513_v50  ;;  %v390_v50 = vld [vmem:[#allocation5 + $0x70] sm:$0xff] }
  0x6e   :  { %5900 = vst [vmem:[#allocation32_spill] sm:$0xff] %v4552_v16  ;;  %3757 = vmatprep.subr.bf16.mxu0 %v3756_v23  ;;  %v522_v36 = vand.u32 4294901760, %v403_v22  ;;  %v5752_v23 = vand.u32 4294901760, %v4552_v16  ;;  %5905 = vst [vmem:[#allocation37_spill] sm:$0xff] %v4581_v41  ;;  %3625 = vmatprep.subr.bf16.mxu1 %v4568_v47  ;;  %v5757_v19 = vand.u32 4294901760, %v4581_v41  ;;  %v4617_v34 = vsub.f32 %v404_v10, %v525_v60  ;;  %v391_v58 = vld [vmem:[#allocation5 + $0x78] sm:$0xff] }
  0x6f   :  { %5909 = vst [vmem:[#allocation41_spill] sm:$0xff] %v4612_v54  ;;  %v5761_v40 = vand.u32 4294901760, %v4612_v54  ;;  %5913 = vst [vmem:[#allocation45_spill] sm:$0xff] %v4626_v4 }
  0x70   :  { %v4583_v1 = vsub.f32 %v403_v22, %v522_v36  ;;  %v3760_v2 = vpack.c.bf16 %v5752_v23, %v5753_v49  ;;  %v528_v22 = vand.u32 4294901760, %v405_v11  ;;  %v4602_v23 = vpack.c.bf16 %v510_v39, %v507_v38  ;;  %5911 = vst [vmem:[#allocation43_spill] sm:$0xff] %v4617_v34  ;;  %v388_v38 = vld [vmem:[#allocation5 + $0x60] sm:$0xff]  ;;  %v389_v39 = vld [vmem:[#allocation5 + $0x68] sm:$0xff] }
  0x71   :  { %3759 = vmatpush3.bf16.msra.mxu0 %v3758_v21  ;;  %3627 = vmatpush3.bf16.msra.mxu1 %v4578_v44  ;;  %v3762_v21 = vpack.c.bf16 %v5758_v5, %v5759_v9  ;;  %v4606_v49 = vpack.c.bf16 %v462_v17, %v459_v45  ;;  %v5760_v45 = vand.u32 4294901760, %v4614_v8  ;;  %v5763_v17 = vand.u32 4294901760, %v4617_v34 }
  0x72   :  { %5906 = vst [vmem:[#allocation38_spill] sm:$0xff] %v4583_v1  ;;  %v5756_v52 = vand.u32 4294901760, %v4583_v1  ;;  %3761 = vmatprep.subr.bf16.mxu0 %v3760_v2  ;;  %5907 = vst [vmem:[#allocation39_spill] sm:$0xff] %v4602_v23  ;;  %3629 = vmatprep.subr.bf16.mxu1 %v4602_v23  ;;  %v4619_v35 = vsub.f32 %v405_v11, %v528_v22  ;;  %v477_v11 = vand.u32 4294901760, %v388_v38 }
  0x73   :  { %5908 = vst [vmem:[#allocation40_spill] sm:$0xff] %v4606_v49  ;;  %v4637_v20 = vpack.c.bf16 %v522_v36, %v519_v43  ;;  %v4648_v9 = vpack.c.bf16 %v474_v7, %v471_v6  ;;  %v668_v36 = vsub.f32 %v4378_v24, %v667_v28  ;;  %v675_v6 = vsub.f32 %v4383_v25, %v674_v31 }
  0x74   :  { %v3764_v2 = vpack.c.bf16 %v5756_v52, %v5757_v19  ;;  %5912 = vst [vmem:[#allocation44_spill] sm:$0xff] %v4619_v35  ;;  %v5762_v10 = vand.u32 4294901760, %v4619_v35  ;;  %v406_v52 = vld [vmem:[#allocation5 + $0xf0] sm:$0xff]  ;;  %v3766_v19 = vpack.c.bf16 %v5760_v45, %v5761_v40  ;;  %v4644_v59 = vsub.f32 %v388_v38, %v477_v11 }
  0x75   :  { %3763 = vmatpush3.bf16.msra.mxu0 %v3762_v21  ;;  %3631 = vmatpush3.bf16.msra.mxu1 %v4606_v49  ;;  %v480_v21 = vand.u32 4294901760, %v389_v39  ;;  %5915 = vst [vmem:[#allocation47_spill] sm:$0xff] %v4637_v20  ;;  %5918 = vst [vmem:[#allocation50_spill] sm:$0xff] %v4648_v9  ;;  %v531_v43 = vand.u32 4294901760, %v406_v52  ;;  %v483_v38 = vand.u32 4294901760, %v390_v50  ;;  %v4663_v28 = vpack.c.bf16 %v528_v22, %v525_v60 }
  0x76   :  { %3765 = vmatprep.subr.bf16.mxu0 %v3764_v2  ;;  %v407_v2 = vld [vmem:[#allocation5 + $0xf8] sm:$0xff]  ;;  %3633 = vmatprep.subr.bf16.mxu1 %v4626_v4  ;;  %v3768_v56 = vpack.c.bf16 %v5762_v10, %v5763_v17  ;;  %5916 = vst [vmem:[#allocation48_spill] sm:$0xff] %v4644_v59  ;;  %v5769_v40 = vand.u32 4294901760, %v4644_v59  ;;  %v486_v17 = vand.u32 4294901760, %v391_v58  ;;  %v5950_v49 = vand.u32 4294901760, %v4644_v59 }
  0x77   :  { %v4646_v5 = vsub.f32 %v389_v39, %v480_v21  ;;  %v534_v45 = vand.u32 4294901760, %v407_v2  ;;  %v4659_v7 = vsub.f32 %v406_v52, %v531_v43  ;;  %5921 = vst [vmem:[#allocation53_spill] sm:$0xff] %v4663_v28  ;;  %v4676_v31 = vsub.f32 %v390_v50, %v483_v38 }
  0x78   :  { %v4680_v22 = vsub.f32 %v391_v58, %v486_v17  ;;  %v5926_v50 = vand.u32 4294901760, %v4418_v63 }
  0x79   :  { %3635 = vmatpush3.bf16.msra.mxu1 %v4628_v3  ;;  %5917 = vst [vmem:[#allocation49_spill] sm:$0xff] %v4646_v5  ;;  %3767 = vmatpush3.bf16.msra.mxu0 %v3766_v19  ;;  %v5768_v10 = vand.u32 4294901760, %v4646_v5  ;;  %5919 = vst [vmem:[#allocation51_spill] sm:$0xff] %v4659_v7  ;;  %v4661_v39 = vsub.f32 %v407_v2, %v534_v45  ;;  %v556_v19 = vsub.f32 %v4388_v26, %v555_v32 }
  0x7a   :  { %3637 = vmatprep.subr.bf16.mxu1 %v4637_v20  ;;  %3769 = vmatprep.subr.bf16.mxu0 %v3768_v56  ;;  %v563_v56 = vsub.f32 %v4393_v27, %v562_v33  ;;  %5922 = vst [vmem:[#allocation54_spill] sm:$0xff] %v4676_v31  ;;  %v5773_v52 = vand.u32 4294901760, %v4659_v7  ;;  %5923 = vst [vmem:[#allocation55_spill] sm:$0xff] %v4680_v22  ;;  %v4683_v32 = vpack.c.bf16 %v480_v21, %v477_v11  ;;  %v435_v27 = vld [vmem:[#allocation5 + $0x1d8] sm:$0xff] }
  0x7b   :  { %5920 = vst [vmem:[#allocation52_spill] sm:$0xff] %v4661_v39  ;;  %v3770_v20 = vpack.c.bf16 %v5768_v10, %v5769_v40  ;;  %v5772_v60 = vand.u32 4294901760, %v4661_v39  ;;  %v669_v33 = vand.u32 4294901760, %v668_v36  ;;  %v5775_v2 = vand.u32 4294901760, %v4676_v31 }
  0x7c   :  { %5924 = vst [vmem:[#allocation56_spill] sm:$0xff] %v4683_v32  ;;  %v4686_v3 = vpack.c.bf16 %v534_v45, %v531_v43  ;;  %v676_v10 = vand.u32 4294901760, %v675_v6  ;;  %v570_v40 = vsub.f32 %v4418_v63, %v5926_v50  ;;  %v557_v11 = vand.u32 4294901760, %v556_v19 }
  0x7d   :  { %3639 = vmatpush3.bf16.msra.mxu1 %v4648_v9  ;;  %3771 = vmatpush3.bf16.msra.mxu0 %v3770_v20  ;;  %v3772_v58 = vpack.c.bf16 %v5772_v60, %v5773_v52  ;;  %v564_v21 = vand.u32 4294901760, %v563_v56  ;;  %v5927_v20 = vand.u32 4294901760, %v4420_v0  ;;  %v4700_v45 = vpack.c.bf16 %v486_v17, %v483_v38 }
  0x7e   :  { %3641 = vmatprep.subr.bf16.mxu1 %v4663_v28  ;;  %5925 = vst [vmem:[#allocation57_spill] sm:$0xff] %v4686_v3  ;;  %v5774_v28 = vand.u32 4294901760, %v4680_v22  ;;  %v571_v6 = vand.u32 4294901760, %v570_v40  ;;  %v5929_v19 = vand.u32 4294901760, %v4459_v30  ;;  %v5930_v50 = vand.u32 4294901760, %v4469_v37 }
  0x7f   :  { %v577_v36 = vsub.f32 %v4420_v0, %v5927_v20  ;;  %5928 = vst [vmem:[#allocation58_spill] sm:$0xff] %v4700_v45  ;;  %3773 = vmatprep.subr.bf16.mxu0 %v3772_v58  ;;  %v3648_v17 = vpack.c.bf16 %v676_v10, %v669_v33  ;;  %v4714_v58 = vpack.c.bf16 %v564_v21, %v557_v11  ;;  %v5931_v60 = vand.u32 4294901760, %v4413_v61 }
  0x80   :  { %v3774_v43 = vpack.c.bf16 %v5774_v28, %v5775_v2  ;;  %v584_v56 = vsub.f32 %v4459_v30, %v5929_v19  ;;  %v591_v20 = vsub.f32 %v4469_v37, %v5930_v50  ;;  %v5932_v40 = vand.u32 4294901760, %v4415_v62  ;;  %v432_v30 = vld [vmem:[#allocation5 + $0x1c0] sm:$0xff] }
  0x81   :  { %3643 = vmatpush3.bf16.msra.mxu1 %v4683_v32  ;;  %v578_v38 = vand.u32 4294901760, %v577_v36  ;;  %v682_v52 = vsub.f32 %v4413_v61, %v5931_v60  ;;  %v5933_v10 = vand.u32 4294901760, %v4512_v18  ;;  %v5934_v11 = vand.u32 4294901760, %v4534_v57  ;;  %v434_v61 = vld [vmem:[#allocation5 + $0x1d0] sm:$0xff] }
  0x82   :  { %3645 = vmatprep.subr.bf16.mxu1 %v4686_v3  ;;  %3775 = vmatpush3.bf16.msra.mxu0 %v3774_v43  ;;  %v689_v28 = vsub.f32 %v4415_v62, %v5932_v40  ;;  %v585_v3 = vand.u32 4294901760, %v584_v56  ;;  %v592_v50 = vand.u32 4294901760, %v591_v20  ;;  %v5936_v43 = vand.u32 4294901760, %v4444_v13 }
  0x83   :  { %v683_v19 = vand.u32 4294901760, %v682_v52  ;;  %v598_v33 = vsub.f32 %v4512_v18, %v5933_v10  ;;  %v605_v21 = vsub.f32 %v4534_v57, %v5934_v11  ;;  %v4730_v60 = vpack.c.bf16 %v578_v38, %v571_v6 }
  0x84   :  { %v690_v2 = vand.u32 4294901760, %v689_v28  ;;  %v5937_v28 = vand.u32 4294901760, %v4454_v29  ;;  %v5944_v9 = vand.u32 4294901760, %v4612_v54  ;;  %v5956_v44 = vand.u32 4294901760, %v4676_v31 }
  0x85   :  { %3647 = vmatpush3.bf16.msra.mxu1 %v4700_v45  ;;  %5935 = vst [vmem:[#allocation59_spill] sm:$0xff] %v4730_v60  ;;  %v599_v40 = vand.u32 4294901760, %v598_v33  ;;  %v606_v10 = vand.u32 4294901760, %v605_v21  ;;  %v5938_v45 = vand.u32 4294901760, %v4558_v48 }
  0x86   :  { %3649 = vmatprep.subr.bf16.mxu1 %v3648_v17  ;;  %v4728_v36 = vpack.c.bf16 %v690_v2, %v683_v19  ;;  %v696_v17 = vsub.f32 %v4444_v13, %v5936_v43  ;;  %v703_v52 = vsub.f32 %v4454_v29, %v5937_v28  ;;  %v5939_v2 = vand.u32 4294901760, %v4572_v51  ;;  %v433_v29 = vld [vmem:[#allocation5 + $0x1c8] sm:$0xff]  ;;  %v416_v13 = vld [vmem:[#allocation5 + $0x140] sm:$0xff] }
  0x87   :  { %v612_v11 = vsub.f32 %v4558_v48, %v5938_v45  ;;  %v4746_v19 = vpack.c.bf16 %v592_v50, %v585_v3  ;;  %v5942_v43 = vand.u32 4294901760, %v4496_v14  ;;  %v1327_v62 = vand.u32 4294901760, %v416_v13 }
  0x88   :  { %v697_v56 = vand.u32 4294901760, %v696_v17  ;;  %v704_v20 = vand.u32 4294901760, %v703_v52  ;;  %v619_v6 = vsub.f32 %v4572_v51, %v5939_v2  ;;  %v5943_v17 = vand.u32 4294901760, %v4501_v15 }
  0x89   :  { %5941 = vst [vmem:[#allocation61_spill] sm:$0xff] %v4746_v19  ;;  %v710_v28 = vsub.f32 %v4496_v14, %v5942_v43  ;;  %v613_v32 = vand.u32 4294901760, %v612_v11  ;;  %v626_v2 = vsub.f32 %v4612_v54, %v5944_v9  ;;  %v5948_v43 = vand.u32 4294901760, %v4546_v55  ;;  %v415_v14 = vld [vmem:[#allocation5 + $0x138] sm:$0xff] }
  0x8a   :  { %v4744_v38 = vpack.c.bf16 %v704_v20, %v697_v56  ;;  %v717_v33 = vsub.f32 %v4501_v15, %v5943_v17  ;;  %v620_v45 = vand.u32 4294901760, %v619_v6  ;;  %v5945_v56 = vand.u32 4294901760, %v4614_v8  ;;  %v414_v15 = vld [vmem:[#allocation5 + $0x130] sm:$0xff] }
  0x8b   :  { %v711_v21 = vand.u32 4294901760, %v710_v28  ;;  %v4762_v20 = vpack.c.bf16 %v606_v10, %v599_v40  ;;  %v724_v17 = vsub.f32 %v4546_v55, %v5948_v43  ;;  %v5949_v28 = vand.u32 4294901760, %v4552_v16 }
  0x8c   :  { %5940 = vst [vmem:[#allocation60_spill] sm:$0xff] %v4744_v38  ;;  %v718_v52 = vand.u32 4294901760, %v717_v33  ;;  %v633_v3 = vsub.f32 %v4614_v8, %v5945_v56  ;;  %v627_v4 = vand.u32 4294901760, %v626_v2  ;;  %v640_v56 = vsub.f32 %v4644_v59, %v5950_v49  ;;  %v428_v59 = vld [vmem:[#allocation5 + $0x1a0] sm:$0xff] }
  0x8d   :  { %5947 = vst [vmem:[#allocation63_spill] sm:$0xff] %v4762_v20  ;;  %v731_v11 = vsub.f32 %v4552_v16, %v5949_v28  ;;  %v725_v6 = vand.u32 4294901760, %v724_v17  ;;  %v5954_v43 = vand.u32 4294901760, %v4581_v41  ;;  %v5955_v17 = vand.u32 4294901760, %v4583_v1  ;;  %v421_v20 = vld [vmem:[#allocation5 + $0x168] sm:$0xff] }
  0x8e   :  { %v4760_v50 = vpack.c.bf16 %v718_v52, %v711_v21  ;;  %v634_v9 = vand.u32 4294901760, %v633_v3  ;;  %v5951_v21 = vand.u32 4294901760, %v4646_v5  ;;  %v4778_v52 = vpack.c.bf16 %v620_v45, %v613_v32 }
  0x8f   :  { %v732_v33 = vand.u32 4294901760, %v731_v11  ;;  %v738_v28 = vsub.f32 %v4581_v41, %v5954_v43  ;;  %v745_v2 = vsub.f32 %v4583_v1, %v5955_v17  ;;  %v641_v23 = vand.u32 4294901760, %v640_v56 }
  0x90   :  { %5946 = vst [vmem:[#allocation62_spill] sm:$0xff] %v4760_v50  ;;  %v647_v40 = vsub.f32 %v4646_v5, %v5951_v21  ;;  %5953 = vst [vmem:[#allocation65_spill] sm:$0xff] %v4778_v52  ;;  %v654_v21 = vsub.f32 %v4676_v31, %v5956_v44  ;;  %v5960_v43 = vand.u32 4294901760, %v4617_v34  ;;  %v411_v5 = vld [vmem:[#allocation5 + $0x118] sm:$0xff]  ;;  %v1363_v54 = vand.u32 4294901760, %v428_v59 }
  0x91   :  { %v4776_v10 = vpack.c.bf16 %v732_v33, %v725_v6  ;;  %v739_v3 = vand.u32 4294901760, %v738_v28  ;;  %v746_v11 = vand.u32 4294901760, %v745_v2  ;;  %v5957_v6 = vand.u32 4294901760, %v4680_v22  ;;  %v439_v50 = vld [vmem:[#allocation5 + $0x1f8] sm:$0xff] }
  0x92   :  { %v648_v49 = vand.u32 4294901760, %v647_v40  ;;  %v4794_v33 = vpack.c.bf16 %v634_v9, %v627_v4  ;;  %v752_v17 = vsub.f32 %v4617_v34, %v5960_v43  ;;  %v5961_v28 = vand.u32 4294901760, %v4619_v35  ;;  %v431_v34 = vld [vmem:[#allocation5 + $0x1b8] sm:$0xff] }
  0x93   :  { %5952 = vst [vmem:[#allocation64_spill] sm:$0xff] %v4776_v10  ;;  %v661_v32 = vsub.f32 %v4680_v22, %v5957_v6  ;;  %v4792_v45 = vpack.c.bf16 %v746_v11, %v739_v3  ;;  %v655_v47 = vand.u32 4294901760, %v654_v21  ;;  %v5964_v3 = vand.u32 4294901760, %v4659_v7  ;;  %v424_v21 = vld [vmem:[#allocation5 + $0x180] sm:$0xff]  ;;  %v427_v22 = vld [vmem:[#allocation5 + $0x198] sm:$0xff] }
  0x94   :  { %5959 = vst [vmem:[#allocation67_spill] sm:$0xff] %v4794_v33  ;;  %v759_v56 = vsub.f32 %v4619_v35, %v5961_v28  ;;  %v753_v40 = vand.u32 4294901760, %v752_v17  ;;  %v4804_v53 = vpack.c.bf16 %v648_v49, %v641_v23  ;;  %v5965_v9 = vand.u32 4294901760, %v4661_v39  ;;  %v420_v10 = vld [vmem:[#allocation5 + $0x160] sm:$0xff] }
  0x95   :  { %5958 = vst [vmem:[#allocation66_spill] sm:$0xff] %v4792_v45  ;;  %v662_v44 = vand.u32 4294901760, %v661_v32  ;;  %v766_v4 = vsub.f32 %v4659_v7, %v5964_v3  ;;  %v425_v32 = vld [vmem:[#allocation5 + $0x188] sm:$0xff]  ;;  %v1351_v28 = vand.u32 4294901760, %v424_v21  ;;  %v408_v3 = vld [vmem:[#allocation5 + $0x100] sm:$0xff]  ;;  %v410_v7 = vld [vmem:[#allocation5 + $0x110] sm:$0xff]  ;;  %v4898_v52 = vsub.f32 %v416_v13, %v1327_v62 }
  0x96   :  { %v760_v2 = vand.u32 4294901760, %v759_v56  ;;  %5963 = vst [vmem:[#allocation69_spill] sm:$0xff] %v4804_v53  ;;  %v773_v11 = vsub.f32 %v4661_v39, %v5965_v9  ;;  %v1354_v56 = vand.u32 4294901760, %v425_v32  ;;  %v1309_v35 = vand.u32 4294901760, %v410_v7  ;;  %v418_v53 = vld [vmem:[#allocation5 + $0x150] sm:$0xff] }
  0x97   :  { %v767_v6 = vand.u32 4294901760, %v766_v4  ;;  %v4814_v17 = vpack.c.bf16 %v662_v44, %v655_v47  ;;  %v4818_v49 = vsub.f32 %v424_v21, %v1351_v28  ;;  %v84_v44 = vld [vmem:[%s5738_s2] sm:$0xf]  ;;  %v1372_v18 = vand.u32 4294901760, %v431_v34 }
  0x98   :  { %v4802_v12 = vpack.c.bf16 %v760_v2, %v753_v40  ;;  %v774_v43 = vand.u32 4294901760, %v773_v11  ;;  %v4816_v23 = vpack.c.bf16 %v1354_v56, %v1351_v28  ;;  %v4820_v40 = vsub.f32 %v425_v32, %v1354_v56 }
  0x99   :  { %5967 = vst [vmem:[#allocation71_spill] sm:$0xff] %v4814_v17  ;;  %v86_v2 = vlaneseq  ;;  %v4854_v37 = vsub.f32 %v410_v7, %v1309_v35  ;;  %v4876_v24 = vsub.f32 %v431_v34, %v1372_v18  ;;  %v1342_v13 = vand.u32 4294901760, %v421_v20 }
  0x9a   :  { %5962 = vst [vmem:[#allocation68_spill] sm:$0xff] %v4802_v12  ;;  %v4812_v46 = vpack.c.bf16 %v774_v43, %v767_v6  ;;  %5968 = vst [vmem:[#allocation72_spill] sm:$0xff] %v4816_v23  ;;  %3809 = vmatprep.subr.bf16.mxu0 %v4816_v23  ;;  %v5838_v17 = vand.u32 4294901760, %v4820_v40  ;;  %v419_v12 = vld [vmem:[#allocation5 + $0x158] sm:$0xff] }
  0x9b   :  { %v4825_v4 = vshrl.u32 %v86_v2, 7  ;;  %v409_v2 = vld [vmem:[#allocation5 + $0x108] sm:$0xff] }
  0x9c   :  { %5966 = vst [vmem:[#allocation70_spill] sm:$0xff] %v4812_v46  ;;  %v1384_v46 = vand.u32 4294901760, %v435_v27 }
  0x9d   :  { %5969 = vst [vmem:[#allocation73_spill] sm:$0xff] %v4825_v4  ;;  %v5809_v47 = vsub.s32 0, %v4825_v4  ;;  %v92_v9 = vsub.s32 1, %v4825_v4  ;;  %v96_v31 = vsub.s32 2, %v4825_v4  ;;  %v100_v39 = vsub.s32 3, %v4825_v4 }
  0x9f   :  { %v89_v11 = vrot.slane %v84_v44, %v5809_v47  ;;  %v93_v6 = vrot.slane %v84_v44, %v92_v9  ;;  %v1303_v47 = vand.u32 4294901760, %v408_v3  ;;  %v1306_v9 = vand.u32 4294901760, %v409_v2 }
  0xa0   :  { %v4836_v8 = vrot.slane %v84_v44, %v96_v31 }
  0xa1   :  { %v4840_v1 = vpack.c.bf16 %v1306_v9, %v1303_v47  ;;  %v4842_v41 = vsub.f32 %v408_v3, %v1303_v47  ;;  %v4844_v16 = vsub.f32 %v409_v2, %v1306_v9  ;;  %v4860_v2 = vsub.f32 %v428_v59, %v1363_v54 }
  0xa3   :  { %5970 = vst [vmem:[#allocation74_spill] sm:$0xff] %v4840_v1 }
 0x11b   :  { %v300_v43 = vpop.f32.mrb[0].mxu1 }
 0x11c   :  { %v301_v21 = vadd.f32 %v300_v43, %v89_v11  ;;  %v302_v32 = vpop.f32.mrb[1].mxu1  ;;  %v429_v11 = vld [vmem:[#allocation5 + $0x1a8] sm:$0xff]  ;;  %v1357_v43 = vand.u32 4294901760, %v426_v42 }
 0x11d   :  { %v303_v28 = vadd.f32 %v302_v32, %v93_v6  ;;  %v304_v56 = vpop.f32.mrb[2].mxu1  ;;  %v1360_v6 = vand.u32 4294901760, %v427_v22  ;;  %v412_v32 = vld [vmem:[#allocation5 + $0x120] sm:$0xff]  ;;  %v1366_v4 = vand.u32 4294901760, %v429_v11 }
 0x11e   :  { %4213 = vtanh.f32 %v301_v21  ;;  %v305_v23 = vpop.f32.mrb[3].mxu1  ;;  %v413_v56 = vld [vmem:[#allocation5 + $0x128] sm:$0xff]  ;;  %v1312_v21 = vand.u32 4294901760, %v411_v5  ;;  %v1315_v51 = vand.u32 4294901760, %v412_v32  ;;  %v4848_v31 = vsub.f32 %v426_v42, %v1357_v43 }
 0x11f   :  { %4215 = vtanh.f32 %v303_v28  ;;  %v430_v23 = vld [vmem:[#allocation5 + $0x1b0] sm:$0xff]  ;;  %v4838_v28 = vrot.slane %v84_v44, %v100_v39  ;;  %v1318_v48 = vand.u32 4294901760, %v413_v56  ;;  %v4846_v55 = vpack.c.bf16 %v1360_v6, %v1357_v43 }
 0x120   :  { %v1369_v57 = vand.u32 4294901760, %v430_v23  ;;  %v4850_v39 = vsub.f32 %v427_v22, %v1360_v6  ;;  %v4852_v44 = vpack.c.bf16 %v1312_v21, %v1309_v35  ;;  %v4856_v3 = vsub.f32 %v411_v5, %v1312_v21  ;;  %v417_v35 = vld [vmem:[#allocation5 + $0x148] sm:$0xff] }
 0x121   :  { %5971 = vst [vmem:[#allocation75_spill] sm:$0xff] %v4846_v55  ;;  %v4858_v47 = vpack.c.bf16 %v1366_v4, %v1363_v54  ;;  %v4862_v9 = vsub.f32 %v429_v11, %v1366_v4  ;;  %v4864_v42 = vpack.c.bf16 %v1318_v48, %v1315_v51  ;;  %v4866_v22 = vsub.f32 %v412_v32, %v1315_v51 }
 0x122   :  { %5972 = vst [vmem:[#allocation76_spill] sm:$0xff] %v4852_v44  ;;  %v1321_v43 = vand.u32 4294901760, %v414_v15  ;;  %v1324_v6 = vand.u32 4294901760, %v415_v14  ;;  %v4868_v21 = vsub.f32 %v413_v56, %v1318_v48  ;;  %v4870_v63 = vpack.c.bf16 %v1372_v18, %v1369_v57 }
 0x123   :  { %5973 = vst [vmem:[#allocation77_spill] sm:$0xff] %v4858_v47  ;;  %5974 = vst [vmem:[#allocation78_spill] sm:$0xff] %v4864_v42  ;;  %v4872_v54 = vsub.f32 %v430_v23, %v1369_v57  ;;  %v1375_v4 = vand.u32 4294901760, %v432_v30  ;;  %v1378_v11 = vand.u32 4294901760, %v433_v29  ;;  %v1330_v51 = vand.u32 4294901760, %v417_v35 }
 0x124   :  { %5975 = vst [vmem:[#allocation79_spill] sm:$0xff] %v4870_v63  ;;  %v5839_v32 = vand.u32 4294901760, %v4818_v49  ;;  %v4878_v48 = vpack.c.bf16 %v1324_v6, %v1321_v43  ;;  %v4880_v56 = vsub.f32 %v414_v15, %v1321_v43  ;;  %v1381_v23 = vand.u32 4294901760, %v434_v61  ;;  %v436_v15 = vld [vmem:[#allocation5 + $0x1e0] sm:$0xff]  ;;  %v437_v43 = vld [vmem:[#allocation5 + $0x1e8] sm:$0xff] }
 0x125   :  { %v4888_v33 = vsub.f32 %v415_v14, %v1324_v6  ;;  %v4890_v18 = vpack.c.bf16 %v1378_v11, %v1375_v4  ;;  %v4892_v34 = vsub.f32 %v432_v30, %v1375_v4  ;;  %v4896_v45 = vpack.c.bf16 %v1330_v51, %v1327_v62 }
 0x126   :  { %5976 = vst [vmem:[#allocation80_spill] sm:$0xff] %v4878_v48  ;;  %v1333_v14 = vand.u32 4294901760, %v418_v53  ;;  %v1336_v6 = vand.u32 4294901760, %v419_v12  ;;  %v4902_v4 = vpack.c.bf16 %v1384_v46, %v1381_v23  ;;  %v1387_v19 = vand.u32 4294901760, %v436_v15 }
 0x127   :  { %5978 = vst [vmem:[#allocation82_spill] sm:$0xff] %v4890_v18  ;;  %5979 = vst [vmem:[#allocation83_spill] sm:$0xff] %v4896_v45  ;;  %v4904_v45 = vsub.f32 %v434_v61, %v1381_v23  ;;  %v1339_v62 = vand.u32 4294901760, %v420_v10 }
 0x128   :  { %v4214_v0 = vpop.eup %4213  ;;  %5981 = vst [vmem:[#allocation85_spill] sm:$0xff] %v4902_v4  ;;  %v4908_v48 = vpack.c.bf16 %v1336_v6, %v1333_v14  ;;  %v4914_v63 = vsub.f32 %v419_v12, %v1336_v6 }
 0x129   :  { %v4216_v7 = vpop.eup %4215  ;;  %v352_v5 = vrot.slane %v4214_v0, 4 }
 0x12a   :  { %v358_v59 = vrot.slane %v4216_v7, 4  ;;  %5982 = vst [vmem:[#allocation86_spill] sm:$0xff] %v4908_v48 }
 0x12b   :  { %v353_v26 = vadd.f32 %v4214_v0, %v352_v5  ;;  %v4886_v0 = vpack.c.bf16 %v5838_v17, %v5839_v32  ;;  %v4900_v32 = vsub.f32 %v417_v35, %v1330_v51  ;;  %v1396_v51 = vand.u32 4294901760, %v439_v50 }
 0x12c   :  { %v359_v25 = vadd.f32 %v4216_v7, %v358_v59  ;;  %v4894_v59 = vsub.f32 %v433_v29, %v1378_v11  ;;  %v422_v29 = vld [vmem:[#allocation5 + $0x170] sm:$0xff]  ;;  %v423_v11 = vld [vmem:[#allocation5 + $0x178] sm:$0xff] }
 0x12d   :  { %v354_v57 = vrot.slane %v353_v26, 2  ;;  %5977 = vst [vmem:[#allocation81_spill] sm:$0xff] %v4886_v0  ;;  %5980 = vst [vmem:[#allocation84_spill] sm:$0xff] %v4900_v32  ;;  %v438_v0 = vld [vmem:[#allocation5 + $0x1f0] sm:$0xff]  ;;  %v1345_v38 = vand.u32 4294901760, %v422_v29  ;;  %v1348_v60 = vand.u32 4294901760, %v423_v11  ;;  %v4912_v32 = vsub.f32 %v418_v53, %v1333_v14 }
 0x12e   :  { %v360_v5 = vrot.slane %v359_v25, 2  ;;  %v1393_v35 = vand.u32 4294901760, %v438_v0 }
 0x12f   :  { %v355_v7 = vadd.f32 %v354_v57, %v353_v26  ;;  %v1390_v26 = vand.u32 4294901760, %v437_v43 }
 0x130   :  { %v361_v17 = vadd.f32 %v360_v5, %v359_v25  ;;  %v4906_v25 = vsub.f32 %v435_v27, %v1384_v46  ;;  %v4924_v46 = vpack.c.bf16 %v1342_v13, %v1339_v62  ;;  %v4933_v53 = vpack.c.bf16 %v1396_v51, %v1393_v35 }
 0x131   :  { %v356_v30 = vrot.slane %v355_v7, 1  ;;  %v4916_v61 = vpack.c.bf16 %v1390_v26, %v1387_v19  ;;  %v4922_v27 = vsub.f32 %v437_v43, %v1390_v26  ;;  %v4943_v43 = vpack.c.bf16 %v1348_v60, %v1345_v38 }
 0x132   :  { %v362_v57 = vrot.slane %v361_v17, 1  ;;  %5984 = vst [vmem:[#allocation88_spill] sm:$0xff] %v4924_v46  ;;  %5985 = vst [vmem:[#allocation89_spill] sm:$0xff] %v4933_v53 }
 0x133   :  { %v357_v18 = vadd.f32 %v356_v30, %v355_v7  ;;  %5983 = vst [vmem:[#allocation87_spill] sm:$0xff] %v4916_v61  ;;  %v4920_v7 = vsub.f32 %v436_v15, %v1387_v19  ;;  %v4929_v30 = vsub.f32 %v420_v10, %v1339_v62  ;;  %v4939_v19 = vsub.f32 %v438_v0, %v1393_v35 }
 0x134   :  { %v363_v5 = vadd.f32 %v362_v57, %v361_v17  ;;  %v4931_v57 = vsub.f32 %v421_v20, %v1342_v13  ;;  %v4941_v15 = vsub.f32 %v439_v50, %v1396_v51  ;;  %5986 = vst [vmem:[#allocation90_spill] sm:$0xff] %v4943_v43  ;;  %v4949_v20 = vsub.f32 %v423_v11, %v1348_v60 }
 0x135   :  { %v4910_v4 = vand.u32 4294901760, %v357_v18  ;;  %v5987_v11 = vand.u32 4294901760, %v4818_v49 }
 0x136   :  { %v4918_v23 = vand.u32 4294901760, %v363_v5 }
 0x137   :  { %v4927_v17 = vsub.f32 %v357_v18, %v4910_v4  ;;  %v4947_v18 = vsub.f32 %v422_v29, %v1345_v38  ;;  %v1530_v13 = vsub.f32 %v4818_v49, %v5987_v11  ;;  %v5991_v11 = vand.u32 4294901760, %v4848_v31 }
 0x138   :  { %1191 = vmatprep.mubr.f32.mxu0 %v4918_v23  ;;  %v4937_v12 = vsub.f32 %v363_v5, %v4918_v23 }
 0x139   :  { %1193 = vmatmul.mubr.f32.vlgmr.msra.gmra.mrb[0].mxu0 %v4910_v4  ;;  %v5846_v10 = vand.u32 4294901760, %v4927_v17  ;;  %v1544_v29 = vsub.f32 %v4848_v31, %v5991_v11 }
 0x13a   :  { %v5847_v6 = vand.u32 4294901760, %v4937_v12  ;;  %3811 = vmatpush3.bf16.msra.mxu0 %v4840_v1 }
 0x13b   :  { %v545_v62 = vsub.f32 %v4927_v17, %v5846_v10  ;;  %v341_v38 = vpop.f32.mrb[4].mxu1  ;;  %3813 = vmatprep.subr.bf16.mxu0 %v4846_v55 }
 0x13c   :  { %v539_v35 = vsub.f32 %v4937_v12, %v5847_v6  ;;  %v342_v51 = vadd.f32 %v341_v38, %v4836_v8  ;;  %v343_v5 = vpop.f32.mrb[5].mxu1  ;;  %v1531_v8 = vand.u32 4294901760, %v1530_v13  ;;  %v5988_v38 = vand.u32 4294901760, %v4820_v40  ;;  %v6001_v13 = vld [vmem:[#allocation59_spill] sm:$0xff] }
 0x13d   :  { %v344_v50 = vadd.f32 %v343_v5, %v4838_v28  ;;  %v345_v0 = vpop.f32.mrb[6].mxu1  ;;  %v546_v26 = vand.u32 4294901760, %v545_v62  ;;  %v5989_v28 = vand.u32 4294901760, %v4842_v41  ;;  %v5990_v5 = vand.u32 4294901760, %v4844_v16 }
 0x13e   :  { %v540_v14 = vand.u32 4294901760, %v539_v35  ;;  %4217 = vtanh.f32 %v342_v51  ;;  %3815 = vmatpush3.bf16.msra.mxu0 %v4852_v44  ;;  %v346_v6 = vpop.f32.mrb[7].mxu1  ;;  %v1537_v10 = vsub.f32 %v4820_v40, %v5988_v38  ;;  %v5996_v51 = vld [vmem:[#allocation79_spill] sm:$0xff] }
 0x13f   :  { %4219 = vtanh.f32 %v344_v50  ;;  %3817 = vmatprep.subr.bf16.mxu0 %v4858_v47  ;;  %v1418_v0 = vsub.f32 %v4842_v41, %v5989_v28  ;;  %v1425_v35 = vsub.f32 %v4844_v16, %v5990_v5  ;;  %v5992_v28 = vand.u32 4294901760, %v4850_v39 }
 0x140   :  { %541 = vmatprep.mubr.f32.mxu1 %v540_v14  ;;  %v1538_v38 = vand.u32 4294901760, %v1537_v10  ;;  %v5997_v14 = vld [vmem:[#allocation84_spill] sm:$0xff]  ;;  %v6006_v5 = vand.u32 4294901760, %v4868_v21 }
 0x141   :  { %547 = vmatmul.mubr.f32.vlgmr.msra.gmra.mrb[8].mxu1 %v546_v26  ;;  %v1419_v50 = vand.u32 4294901760, %v1418_v0  ;;  %v1426_v62 = vand.u32 4294901760, %v1425_v35  ;;  %v1551_v60 = vsub.f32 %v4850_v39, %v5992_v28  ;;  %v1545_v0 = vand.u32 4294901760, %v1544_v29 }
 0x142   :  { %3651 = vmatpush3.bf16.msra.mxu1 %v4714_v58  ;;  %777 = vmatprep.mubr.f32.mxu1 %v4918_v23  ;;  %v5001_v26 = vpack.c.bf16 %v1538_v38, %v1531_v8  ;;  %v5995_v58 = vand.u32 4294901760, %v4854_v37  ;;  %v6002_v8 = vand.u32 4294901760, %v4862_v9 }
 0x143   :  { %3653 = vmatprep.subr.bf16.mxu1 %v4728_v36  ;;  %3819 = vmatpush3.bf16.msra.mxu0 %v4864_v42  ;;  %v5005_v11 = vpack.c.bf16 %v1426_v62, %v1419_v50  ;;  %v1552_v35 = vand.u32 4294901760, %v1551_v60  ;;  %v5998_v36 = vand.u32 4294901760, %v4856_v3  ;;  %v6000_v62 = vand.u32 4294901760, %v4860_v2  ;;  %v6007_v42 = vld [vmem:[#allocation82_spill] sm:$0xff] }
 0x144   :  { %5993 = vst [vmem:[#allocation91_spill] sm:$0xff] %v5001_v26  ;;  %v1432_v28 = vsub.f32 %v4854_v37, %v5995_v58  ;;  %3821 = vmatprep.subr.bf16.mxu0 %v5996_v51  ;;  %v1565_v6 = vsub.f32 %v4862_v9, %v6002_v8 }
 0x145   :  { %5994 = vst [vmem:[#allocation92_spill] sm:$0xff] %v5005_v11  ;;  %v1439_v38 = vsub.f32 %v4856_v3, %v5998_v36  ;;  %v5018_v29 = vpack.c.bf16 %v1552_v35, %v1545_v0  ;;  %v1558_v58 = vsub.f32 %v4860_v2, %v6000_v62  ;;  %v6003_v36 = vand.u32 4294901760, %v4866_v22  ;;  %v6004_v0 = vld [vmem:[#allocation60_spill] sm:$0xff]  ;;  %v6009_v62 = vld [vmem:[#allocation61_spill] sm:$0xff] }
 0x146   :  { %v1433_v60 = vand.u32 4294901760, %v1432_v28  ;;  %3655 = vmatpush3.bf16.msra.mxu1 %v6001_v13  ;;  %v6005_v35 = vld [vmem:[#allocation80_spill] sm:$0xff]  ;;  %v1566_v47 = vand.u32 4294901760, %v1565_v6  ;;  %v6012_v6 = vld [vmem:[#allocation62_spill] sm:$0xff] }
 0x147   :  { %5999 = vst [vmem:[#allocation84_spill] sm:$0xff] %v5018_v29  ;;  %v1440_v10 = vand.u32 4294901760, %v1439_v38  ;;  %v1446_v50 = vsub.f32 %v4866_v22, %v6003_v36  ;;  %3657 = vmatprep.subr.bf16.mxu1 %v6004_v0  ;;  %3823 = vmatpush3.bf16.msra.mxu0 %v6005_v35  ;;  %v1559_v13 = vand.u32 4294901760, %v1558_v58  ;;  %v1453_v38 = vsub.f32 %v4868_v21, %v6006_v5  ;;  %v6013_v36 = vld [vmem:[#allocation83_spill] sm:$0xff] }
 0x148   :  { %v4218_v51 = vpop.eup %4217  ;;  %3825 = vmatprep.subr.bf16.mxu0 %v6007_v42  ;;  %v6016_v42 = vand.u32 4294901760, %v4876_v24 }
 0x149   :  { %v5039_v8 = vpack.c.bf16 %v1440_v10, %v1433_v60  ;;  %v1447_v0 = vand.u32 4294901760, %v1446_v50  ;;  %v4220_v44 = vpop.eup %4219  ;;  %v364_v35 = vrot.slane %v4218_v51, 4  ;;  %v1454_v55 = vand.u32 4294901760, %v1453_v38 }
 0x14a   :  { %3659 = vmatpush3.bf16.msra.mxu1 %v6009_v62  ;;  %v370_v1 = vrot.slane %v4220_v44, 4  ;;  %v5045_v5 = vpack.c.bf16 %v1566_v47, %v1559_v13  ;;  %v6011_v10 = vand.u32 4294901760, %v4872_v54  ;;  %v6015_v47 = vld [vmem:[#allocation85_spill] sm:$0xff]  ;;  %v6021_v62 = vld [vmem:[#allocation63_spill] sm:$0xff] }
 0x14b   :  { %6008 = vst [vmem:[#allocation59_spill] sm:$0xff] %v5039_v8  ;;  %3661 = vmatprep.subr.bf16.mxu1 %v6012_v6  ;;  %v365_v50 = vadd.f32 %v4218_v51, %v364_v35  ;;  %3827 = vmatpush3.bf16.msra.mxu0 %v6013_v36  ;;  %v5053_v28 = vpack.c.bf16 %v1454_v55, %v1447_v0  ;;  %v6018_v55 = vand.u32 4294901760, %v4888_v33  ;;  %v6019_v6 = vand.u32 4294901760, %v4892_v34 }
 0x14c   :  { %6010 = vst [vmem:[#allocation60_spill] sm:$0xff] %v5045_v5  ;;  %v1572_v60 = vsub.f32 %v4872_v54, %v6011_v10  ;;  %v371_v58 = vadd.f32 %v4220_v44, %v370_v1  ;;  %3829 = vmatprep.subr.bf16.mxu0 %v6015_v47  ;;  %v1579_v5 = vsub.f32 %v4876_v24, %v6016_v42  ;;  %v6017_v10 = vand.u32 4294901760, %v4880_v56 }
 0x14d   :  { %6014 = vst [vmem:[#allocation61_spill] sm:$0xff] %v5053_v28  ;;  %v366_v35 = vrot.slane %v365_v50, 2  ;;  %v1467_v0 = vsub.f32 %v4888_v33, %v6018_v55  ;;  %v1586_v1 = vsub.f32 %v4892_v34, %v6019_v6  ;;  %v6020_v44 = vand.u32 4294901760, %v4894_v59  ;;  %v6023_v28 = vld [vmem:[#allocation64_spill] sm:$0xff] }
 0x14e   :  { %v1573_v13 = vand.u32 4294901760, %v1572_v60  ;;  %v1460_v51 = vsub.f32 %v4880_v56, %v6017_v10  ;;  %3663 = vmatpush3.bf16.msra.mxu1 %v6021_v62  ;;  %v372_v42 = vrot.slane %v371_v58, 2  ;;  %v1580_v38 = vand.u32 4294901760, %v1579_v5 }
 0x14f   :  { %v1593_v60 = vsub.f32 %v4894_v59, %v6020_v44  ;;  %v6022_v10 = vand.u32 4294901760, %v4898_v52  ;;  %3665 = vmatprep.subr.bf16.mxu1 %v6023_v28  ;;  %v367_v55 = vadd.f32 %v366_v35, %v365_v50  ;;  %3831 = vmatpush3.bf16.msra.mxu0 %v4908_v48  ;;  %v1468_v8 = vand.u32 4294901760, %v1467_v0  ;;  %v6026_v0 = vld [vmem:[#allocation65_spill] sm:$0xff]  ;;  %v6049_v48 = vld [vmem:[#allocation71_spill] sm:$0xff] }
 0x150   :  { %v1461_v47 = vand.u32 4294901760, %v1460_v51  ;;  %v1587_v6 = vand.u32 4294901760, %v1586_v1  ;;  %3833 = vmatprep.subr.bf16.mxu0 %v4916_v61  ;;  %v373_v44 = vadd.f32 %v372_v42, %v371_v58  ;;  %v5080_v11 = vpack.c.bf16 %v1580_v38, %v1573_v13 }
 0x151   :  { %v1474_v36 = vsub.f32 %v4898_v52, %v6022_v10  ;;  %v1594_v29 = vand.u32 4294901760, %v1593_v60  ;;  %v6024_v5 = vand.u32 4294901760, %v5997_v14  ;;  %v368_v26 = vrot.slane %v367_v55, 1 }
 0x152   :  { %v5085_v10 = vpack.c.bf16 %v1468_v8, %v1461_v47  ;;  %v6025_v50 = vand.u32 4294901760, %v4904_v45  ;;  %3667 = vmatpush3.bf16.msra.mxu1 %v6026_v0  ;;  %v374_v1 = vrot.slane %v373_v44, 1  ;;  %v6027_v38 = vand.u32 4294901760, %v4906_v25  ;;  %v6029_v8 = vld [vmem:[#allocation66_spill] sm:$0xff] }
 0x153   :  { %v1475_v62 = vand.u32 4294901760, %v1474_v36  ;;  %v1481_v51 = vsub.f32 %v5997_v14, %v6024_v5  ;;  %v5087_v28 = vpack.c.bf16 %v1594_v29, %v1587_v6  ;;  %v6028_v13 = vand.u32 4294901760, %v4912_v32  ;;  %3669 = vmatprep.subr.bf16.mxu1 %v6029_v8  ;;  %3835 = vmatpush3.bf16.msra.mxu0 %v4924_v46 }
 0x154   :  { %v1600_v35 = vsub.f32 %v4904_v45, %v6025_v50  ;;  %v1607_v36 = vsub.f32 %v4906_v25, %v6027_v38  ;;  %v369_v29 = vadd.f32 %v368_v26, %v367_v55  ;;  %v6030_v42 = vand.u32 4294901760, %v4914_v63  ;;  %3837 = vmatprep.subr.bf16.mxu0 %v4933_v53 }
 0x155   :  { %v1482_v58 = vand.u32 4294901760, %v1481_v51  ;;  %v1488_v60 = vsub.f32 %v4912_v32, %v6028_v13  ;;  %v6031_v5 = vand.u32 4294901760, %v4920_v7  ;;  %v375_v50 = vadd.f32 %v374_v1, %v373_v44 }
 0x156   :  { %v1601_v47 = vand.u32 4294901760, %v1600_v35  ;;  %v1495_v6 = vsub.f32 %v4914_v63, %v6030_v42  ;;  %v1608_v38 = vand.u32 4294901760, %v1607_v36  ;;  %v5110_v8 = vand.u32 4294901760, %v369_v29  ;;  %v6033_v42 = vld [vmem:[#allocation67_spill] sm:$0xff]  ;;  %v6036_v36 = vld [vmem:[#allocation68_spill] sm:$0xff] }
 0x157   :  { %v1614_v51 = vsub.f32 %v4920_v7, %v6031_v5  ;;  %v5108_v0 = vpack.c.bf16 %v1482_v58, %v1475_v62  ;;  %v1489_v13 = vand.u32 4294901760, %v1488_v60  ;;  %v6032_v55 = vand.u32 4294901760, %v4922_v27  ;;  %3671 = vmatpush3.bf16.msra.mxu1 %v6033_v42  ;;  %3839 = vmatpush3.bf16.msra.mxu0 %v4943_v43  ;;  %v6043_v43 = vld [vmem:[#allocation69_spill] sm:$0xff] }
 0x158   :  { %v1496_v46 = vand.u32 4294901760, %v1495_v6  ;;  %v5116_v61 = vand.u32 4294901760, %v375_v50  ;;  %v5118_v5 = vpack.c.bf16 %v1608_v38, %v1601_v47  ;;  %v6034_v44 = vand.u32 4294901760, %v4929_v30  ;;  %3673 = vmatprep.subr.bf16.mxu1 %v6036_v36 }
 0x159   :  { %v1615_v26 = vand.u32 4294901760, %v1614_v51  ;;  %v1621_v35 = vsub.f32 %v4922_v27, %v6032_v55  ;;  %v6035_v1 = vand.u32 4294901760, %v4931_v57  ;;  %v5129_v60 = vsub.f32 %v369_v29, %v5110_v8 }
 0x15a   :  { %v1502_v62 = vsub.f32 %v4929_v30, %v6034_v44  ;;  %v5131_v6 = vpack.c.bf16 %v1496_v46, %v1489_v13  ;;  %v6038_v47 = vand.u32 4294901760, %v4939_v19  ;;  %v5137_v55 = vsub.f32 %v375_v50, %v5116_v61 }
 0x15b   :  { %v1509_v58 = vsub.f32 %v4931_v57, %v6035_v1  ;;  %v1622_v51 = vand.u32 4294901760, %v1621_v35  ;;  %v6039_v42 = vpack.c.bf16 %v4820_v40, %v4818_v49  ;;  %v6040_v36 = vand.u32 4294901760, %v4941_v15  ;;  %3675 = vmatpush3.bf16.msra.mxu1 %v6043_v43 }
 0x15c   :  { %6037 = vst [vmem:[#allocation62_spill] sm:$0xff] %v5131_v6  ;;  %v1628_v38 = vsub.f32 %v4939_v19, %v6038_v47  ;;  %v1503_v44 = vand.u32 4294901760, %v1502_v62  ;;  %v5868_v46 = vand.u32 4294901760, %v5129_v60  ;;  %v6042_v47 = vand.u32 4294901760, %v4947_v18 }
 0x15d   :  { %3873 = vmatprep.subr.bf16.mxu0 %v6039_v42  ;;  %v1510_v1 = vand.u32 4294901760, %v1509_v58  ;;  %v1635_v29 = vsub.f32 %v4941_v15, %v6040_v36  ;;  %v5146_v13 = vpack.c.bf16 %v1622_v51, %v1615_v26  ;;  %v1400_v49 = vand.u32 4294901760, %v5137_v55  ;;  %v6046_v36 = vld [vmem:[#allocation70_spill] sm:$0xff]  ;;  %v6047_v26 = vld [vmem:[#allocation11_spill] sm:$0xff]  ;;  %v6048_v51 = vld [vmem:[#allocation12_spill] sm:$0xff] }
 0x15e   :  { %v1629_v35 = vand.u32 4294901760, %v1628_v38  ;;  %v1516_v50 = vsub.f32 %v4947_v18, %v6042_v47  ;;  %v6045_v58 = vand.u32 4294901760, %v4949_v20  ;;  %3677 = vmatprep.subr.bf16.mxu1 %v6046_v36  ;;  %v3680_v38 = vpack.c.bf16 %v6048_v51, %v6047_v26  ;;  %v6051_v36 = vld [vmem:[#allocation14_spill] sm:$0xff]  ;;  %v6052_v51 = vld [vmem:[#allocation15_spill] sm:$0xff] }
 0x15f   :  { %6041 = vst [vmem:[#allocation63_spill] sm:$0xff] %v5146_v13  ;;  %v5153_v40 = vpack.c.bf16 %v1510_v1, %v1503_v44  ;;  %v1636_v62 = vand.u32 4294901760, %v1635_v29  ;;  %v1407_v47 = vsub.f32 %v5129_v60, %v5868_v46  ;;  %v1401_v43 = vsub.f32 %v5137_v55, %v1400_v49  ;;  %3679 = vmatpush3.bf16.msra.mxu1 %v6049_v48  ;;  %v6053_v46 = vld [vmem:[#allocation16_spill] sm:$0xff]  ;;  %v6054_v48 = vld [vmem:[#allocation17_spill] sm:$0xff] }
 0x160   :  { %v1523_v42 = vsub.f32 %v4949_v20, %v6045_v58  ;;  %v1517_v53 = vand.u32 4294901760, %v1516_v50  ;;  %v6050_v58 = vld [vmem:[#allocation13_spill] sm:$0xff]  ;;  %3681 = vmatprep.subr.bf16.mxu1 %v3680_v38  ;;  %v3684_v50 = vpack.c.bf16 %v6053_v46, %v6052_v51  ;;  %v3874_v6 = vpack.c.bf16 %v4844_v16, %v4842_v41  ;;  %v6057_v38 = vld [vmem:[#allocation20_spill] sm:$0xff] }
 0x161   :  { %6044 = vst [vmem:[#allocation64_spill] sm:$0xff] %v5153_v40  ;;  %v5167_v44 = vpack.c.bf16 %v1636_v62, %v1629_v35  ;;  %v1408_v29 = vand.u32 4294901760, %v1407_v47  ;;  %v3682_v40 = vpack.c.bf16 %v6051_v36, %v6050_v58  ;;  %v1402_v13 = vand.u32 4294901760, %v1401_v43  ;;  %v6059_v43 = vld [vmem:[#allocation22_spill] sm:$0xff] }
 0x162   :  { %v1524_v1 = vand.u32 4294901760, %v1523_v42  ;;  %v3876_v35 = vpack.c.bf16 %v4850_v39, %v4848_v31  ;;  %779 = vmatmul.mubr.f32.vlgmr.msra.gmra.mrb[10].mxu1 %v4910_v4  ;;  %v6056_v42 = vld [vmem:[#allocation19_spill] sm:$0xff]  ;;  %v3880_v47 = vpack.c.bf16 %v4862_v9, %v4860_v2  ;;  %v6061_v58 = vld [vmem:[#allocation26_spill] sm:$0xff]  ;;  %v3884_v51 = vpack.c.bf16 %v4876_v24, %v4872_v54 }
 0x163   :  { %1403 = vmatprep.mubr.f32.mxu0 %v1402_v13  ;;  %3683 = vmatpush3.bf16.msra.mxu1 %v3682_v40  ;;  %v3688_v46 = vpack.c.bf16 %v6057_v38, %v6056_v42  ;;  %v3878_v13 = vpack.c.bf16 %v4856_v3, %v4854_v37  ;;  %v6058_v40 = vld [vmem:[#allocation21_spill] sm:$0xff]  ;;  %v3886_v38 = vpack.c.bf16 %v4888_v33, %v4880_v56 }
 0x164   :  { %v5172_v26 = vpack.c.bf16 %v1524_v1, %v1517_v53  ;;  %1409 = vmatmul.mubr.f32.vlgmr.msra.gmra.mrb[2].mxu0 %v1408_v29  ;;  %914 = vmatprep.mubr.f32.mxu1 %v4937_v12  ;;  %v6055_v53 = vld [vmem:[#allocation18_spill] sm:$0xff]  ;;  %v3690_v1 = vpack.c.bf16 %v6059_v43, %v6058_v40  ;;  %v6060_v29 = vld [vmem:[#allocation25_spill] sm:$0xff] }
 0x165   :  { %v3686_v62 = vpack.c.bf16 %v6055_v53, %v6054_v48  ;;  %3685 = vmatprep.subr.bf16.mxu1 %v3684_v50  ;;  %3875 = vmatpush3.bf16.msra.mxu0 %v3874_v6  ;;  %v3692_v36 = vpack.c.bf16 %v6061_v58, %v6060_v29  ;;  %v3882_v6 = vpack.c.bf16 %v4868_v21, %v4866_v22  ;;  %v6062_v50 = vld [vmem:[#allocation27_spill] sm:$0xff]  ;;  %v6068_v43 = vld [vmem:[#allocation37_spill] sm:$0xff] }
 0x166   :  { %3877 = vmatprep.subr.bf16.mxu0 %v3876_v35  ;;  %1776 = vmatprep.mubr.f32.mxu0 %v5137_v55  ;;  %v6063_v35 = vld [vmem:[#allocation29_spill] sm:$0xff]  ;;  %v6064_v53 = vld [vmem:[#allocation31_spill] sm:$0xff]  ;;  %v3890_v58 = vpack.c.bf16 %v5997_v14, %v4898_v52  ;;  %v6149_v55 = vld [vmem:[#allocation86_spill] sm:$0xff] }
 0x167   :  { %3687 = vmatpush3.bf16.msra.mxu1 %v3686_v62  ;;  %v3694_v48 = vpack.c.bf16 %v6063_v35, %v6062_v50  ;;  %v6065_v62 = vld [vmem:[#allocation32_spill] sm:$0xff]  ;;  %v6072_v35 = vld [vmem:[#allocation43_spill] sm:$0xff] }
 0x168   :  { %3689 = vmatprep.subr.bf16.mxu1 %v3688_v46  ;;  %v3696_v42 = vpack.c.bf16 %v6065_v62, %v6064_v53  ;;  %v3888_v46 = vpack.c.bf16 %v4894_v59, %v4892_v34  ;;  %v3894_v62 = vpack.c.bf16 %v4914_v63, %v4912_v32 }
 0x169   :  { %3879 = vmatpush3.bf16.msra.mxu0 %v3878_v13  ;;  %v6066_v13 = vld [vmem:[#allocation33_spill] sm:$0xff] }
 0x16a   :  { %3881 = vmatprep.subr.bf16.mxu0 %v3880_v47  ;;  %v6067_v47 = vld [vmem:[#allocation35_spill] sm:$0xff] }
 0x16b   :  { %3691 = vmatpush3.bf16.msra.mxu1 %v3690_v1  ;;  %v3698_v40 = vpack.c.bf16 %v6067_v47, %v6066_v13  ;;  %v6069_v1 = vld [vmem:[#allocation38_spill] sm:$0xff]  ;;  %v6076_v47 = vld [vmem:[#allocation51_spill] sm:$0xff] }
 0x16c   :  { %3693 = vmatprep.subr.bf16.mxu1 %v3692_v36  ;;  %v3700_v29 = vpack.c.bf16 %v6069_v1, %v6068_v43  ;;  %v3892_v36 = vpack.c.bf16 %v4906_v25, %v4904_v45  ;;  %v3898_v1 = vpack.c.bf16 %v4931_v57, %v4929_v30 }
 0x16d   :  { %3883 = vmatpush3.bf16.msra.mxu0 %v3882_v6  ;;  %v6070_v6 = vld [vmem:[#allocation41_spill] sm:$0xff] }
 0x16e   :  { %3885 = vmatprep.subr.bf16.mxu0 %v3884_v51  ;;  %v6071_v51 = vld [vmem:[#allocation42_spill] sm:$0xff] }
 0x16f   :  { %3695 = vmatpush3.bf16.msra.mxu1 %v3694_v48  ;;  %v3702_v50 = vpack.c.bf16 %v6071_v51, %v6070_v6  ;;  %v6073_v48 = vld [vmem:[#allocation44_spill] sm:$0xff]  ;;  %v3902_v51 = vpack.c.bf16 %v4949_v20, %v4947_v18 }
 0x170   :  { %3697 = vmatprep.subr.bf16.mxu1 %v3696_v42  ;;  %v3704_v53 = vpack.c.bf16 %v6073_v48, %v6072_v35  ;;  %v3896_v42 = vpack.c.bf16 %v4922_v27, %v4920_v7  ;;  %v6081_v35 = vld [vmem:[#allocation81_spill] sm:$0xff]  ;;  %v6082_v48 = vand.u32 4294901760, %v4842_v41  ;;  %v6089_v41 = vand.u32 4294901760, %v4854_v37 }
 0x171   :  { %3887 = vmatpush3.bf16.msra.mxu0 %v3886_v38  ;;  %v6074_v38 = vld [vmem:[#allocation48_spill] sm:$0xff]  ;;  %v6096_v37 = vand.u32 4294901760, %v4868_v21  ;;  %v6104_v21 = vand.u32 4294901760, %v4894_v59  ;;  %v6112_v59 = vld [vmem:[#allocation47_spill] sm:$0xff] }
 0x172   :  { %3889 = vmatprep.subr.bf16.mxu0 %v3888_v46  ;;  %v6075_v46 = vld [vmem:[#allocation49_spill] sm:$0xff] }
 0x173   :  { %3699 = vmatpush3.bf16.msra.mxu1 %v3698_v40  ;;  %v3706_v13 = vpack.c.bf16 %v6075_v46, %v6074_v38  ;;  %v6077_v40 = vld [vmem:[#allocation52_spill] sm:$0xff]  ;;  %v6085_v38 = vand.u32 4294901760, %v4850_v39  ;;  %v6092_v39 = vand.u32 4294901760, %v4862_v9  ;;  %v6100_v9 = vld [vmem:[#allocation39_spill] sm:$0xff] }
 0x174   :  { %3701 = vmatprep.subr.bf16.mxu1 %v3700_v29  ;;  %v3708_v43 = vpack.c.bf16 %v6077_v40, %v6076_v47  ;;  %v3900_v29 = vpack.c.bf16 %v4941_v15, %v4939_v19  ;;  %v6087_v47 = vand.u32 4294901760, %v4937_v12  ;;  %v6088_v40 = vld [vmem:[#allocation28_spill] sm:$0xff]  ;;  %v6093_v12 = vld [vmem:[#allocation30_spill] sm:$0xff] }
 0x175   :  { %3891 = vmatpush3.bf16.msra.mxu0 %v3890_v58  ;;  %v6078_v58 = vld [vmem:[#allocation54_spill] sm:$0xff] }
 0x176   :  { %3893 = vmatprep.subr.bf16.mxu0 %v3892_v36  ;;  %v6079_v36 = vld [vmem:[#allocation55_spill] sm:$0xff] }
 0x177   :  { %3703 = vmatpush3.bf16.msra.mxu1 %v3702_v50  ;;  %v3710_v6 = vpack.c.bf16 %v6079_v36, %v6078_v58  ;;  %v6080_v50 = vld [vmem:[#allocation23_spill] sm:$0xff]  ;;  %v6095_v58 = vand.u32 4294901760, %v4866_v22  ;;  %v6103_v22 = vand.u32 4294901760, %v4892_v34  ;;  %v6111_v34 = vld [vmem:[#allocation46_spill] sm:$0xff] }
 0x178   :  { %3705 = vmatprep.subr.bf16.mxu1 %v3704_v53  ;;  %v6083_v53 = vand.u32 4294901760, %v4844_v16  ;;  %v6090_v16 = vand.u32 4294901760, %v4856_v3  ;;  %v6097_v3 = vand.u32 4294901760, %v4872_v54  ;;  %v6105_v54 = vld [vmem:[#allocation40_spill] sm:$0xff] }
 0x179   :  { %3895 = vmatpush3.bf16.msra.mxu0 %v3894_v62  ;;  %v3946_v36 = vpack.c.bf16 %v6096_v37, %v6095_v58 }
 0x17a   :  { %3897 = vmatprep.subr.bf16.mxu0 %v3896_v42  ;;  %v3938_v62 = vpack.c.bf16 %v6083_v53, %v6082_v48  ;;  %v6084_v42 = vand.u32 4294901760, %v4848_v31  ;;  %v6091_v31 = vand.u32 4294901760, %v4860_v2  ;;  %v6099_v2 = vld [vmem:[#allocation36_spill] sm:$0xff]  ;;  %v6102_v48 = vand.u32 4294901760, %v4888_v33 }
 0x17b   :  { %3707 = vmatpush3.bf16.msra.mxu1 %v3706_v13  ;;  %v6086_v13 = vld [vmem:[#allocation24_spill] sm:$0xff]  ;;  %v6109_v33 = vand.u32 4294901760, %v4904_v45  ;;  %v6117_v45 = vld [vmem:[#allocation50_spill] sm:$0xff] }
 0x17c   :  { %3709 = vmatprep.subr.bf16.mxu1 %v3708_v43  ;;  %v3940_v46 = vpack.c.bf16 %v6085_v38, %v6084_v42  ;;  %v3942_v43 = vpack.c.bf16 %v6090_v16, %v6089_v41  ;;  %v6107_v42 = vand.u32 4294901760, %v4898_v52  ;;  %v6108_v38 = vand.u32 4294901760, %v5997_v14 }
 0x17d   :  { %3899 = vmatpush3.bf16.msra.mxu0 %v3898_v1  ;;  %v3944_v1 = vpack.c.bf16 %v6092_v39, %v6091_v31  ;;  %v6113_v41 = vand.u32 4294901760, %v4912_v32  ;;  %v6114_v16 = vand.u32 4294901760, %v4914_v63  ;;  %v6115_v52 = vand.u32 4294901760, %v4920_v7  ;;  %v6123_v7 = vld [vmem:[#allocation56_spill] sm:$0xff] }
 0x17e   :  { %3901 = vmatprep.subr.bf16.mxu0 %v3900_v29  ;;  %v6094_v29 = vld [vmem:[#allocation34_spill] sm:$0xff]  ;;  %v6116_v14 = vand.u32 4294901760, %v4922_v27  ;;  %v6119_v39 = vand.u32 4294901760, %v4929_v30  ;;  %v6121_v63 = vand.u32 4294901760, %v4939_v19  ;;  %v6122_v32 = vand.u32 4294901760, %v4941_v15  ;;  %v6124_v27 = vld [vmem:[#allocation57_spill] sm:$0xff] }
 0x17f   :  { %3711 = vmatpush3.bf16.msra.mxu1 %v3710_v6  ;;  %v6098_v6 = vand.u32 4294901760, %v4876_v24  ;;  %v6106_v24 = vld [vmem:[#allocation45_spill] sm:$0xff]  ;;  %v6127_v30 = vld [vmem:[#allocation58_spill] sm:$0xff]  ;;  %v6131_v19 = vld [vmem:[#allocation84_spill] sm:$0xff] }
 0x180   :  { %3713 = vmatprep.subr.bf16.mxu1 %v6080_v50  ;;  %v3960_v31 = vpack.c.bf16 %v6116_v14, %v6115_v52  ;;  %v3964_v37 = vpack.c.bf16 %v6122_v32, %v6121_v63  ;;  %v6132_v15 = vld [vmem:[#allocation59_spill] sm:$0xff]  ;;  %v2176_v63 = vld [vmem:[%s5740_s4] sm:$0xff] }
 0x181   :  { %3903 = vmatpush3.bf16.msra.mxu0 %v3902_v51  ;;  %v3948_v51 = vpack.c.bf16 %v6098_v6, %v6097_v3  ;;  %v6126_v3 = vand.u32 4294901760, %v4949_v20  ;;  %v6134_v20 = vld [vmem:[#allocation61_spill] sm:$0xff]  ;;  %v2177_v32 = vld [vmem:[%s5740_s4 + $0x8] sm:$0xff] }
 0x182   :  { %3937 = vmatprep.subr.bf16.mxu0 %v6081_v35  ;;  %917 = vmatmul.mubr.f32.vlgmr.msra.gmra.mrb[12].mxu1 %v4927_v17  ;;  %v6101_v35 = vand.u32 4294901760, %v4880_v56  ;;  %v6110_v56 = vand.u32 4294901760, %v4906_v25  ;;  %v6118_v25 = vld [vmem:[#allocation53_spill] sm:$0xff] }
 0x183   :  { %3715 = vmatpush3.bf16.msra.mxu1 %v6086_v13  ;;  %1021 = vmatprep.mubr.f32.mxu1 %v6087_v47 }
 0x184   :  { %3717 = vmatprep.subr.bf16.mxu1 %v6088_v40  ;;  %1779 = vmatmul.mubr.f32.vlgmr.msra.gmra.mrb[4].mxu0 %v5129_v60  ;;  %v3950_v53 = vpack.c.bf16 %v6102_v48, %v6101_v35  ;;  %v3956_v47 = vpack.c.bf16 %v6110_v56, %v6109_v33  ;;  %v6153_v35 = vld [vmem:[#allocation90_spill] sm:$0xff]  ;;  %v6154_v48 = vand.u32 4294901760, %v5129_v60 }
 0x185   :  { %3939 = vmatpush3.bf16.msra.mxu0 %v3938_v62  ;;  %2053 = vmatprep.mubr.f32.mxu0 %v5116_v61  ;;  %v3952_v62 = vpack.c.bf16 %v6104_v21, %v6103_v22 }
 0x186   :  { %3941 = vmatprep.subr.bf16.mxu0 %v3940_v46  ;;  %v3954_v46 = vpack.c.bf16 %v6108_v38, %v6107_v42 }
 0x187   :  { %3719 = vmatpush3.bf16.msra.mxu1 %v6093_v12 }
 0x188   :  { %3721 = vmatprep.subr.bf16.mxu1 %v6094_v29 }
 0x189   :  { %3943 = vmatpush3.bf16.msra.mxu0 %v3942_v43  ;;  %v3958_v43 = vpack.c.bf16 %v6114_v16, %v6113_v41 }
 0x18a   :  { %3945 = vmatprep.subr.bf16.mxu0 %v3944_v1  ;;  %v6120_v1 = vand.u32 4294901760, %v4931_v57  ;;  %v6128_v57 = vand.u32 4294901760, %v4927_v17  ;;  %v6130_v17 = vld [vmem:[#allocation92_spill] sm:$0xff] }
 0x18b   :  { %3723 = vmatpush3.bf16.msra.mxu1 %v6099_v2 }
 0x18c   :  { %3725 = vmatprep.subr.bf16.mxu1 %v6100_v9  ;;  %v3962_v58 = vpack.c.bf16 %v6120_v1, %v6119_v39 }
 0x18d   :  { %3947 = vmatpush3.bf16.msra.mxu0 %v3946_v36  ;;  %v6125_v36 = vand.u32 4294901760, %v4947_v18  ;;  %v6133_v18 = vld [vmem:[#allocation60_spill] sm:$0xff] }
 0x18e   :  { %3949 = vmatprep.subr.bf16.mxu0 %v3948_v51  ;;  %v6148_v51 = vld [vmem:[#allocation85_spill] sm:$0xff] }
 0x18f   :  { %3727 = vmatpush3.bf16.msra.mxu1 %v6105_v54  ;;  %v3966_v6 = vpack.c.bf16 %v6126_v3, %v6125_v36  ;;  %v4305_v36 = vmov 0.0|0.0   ;;  %v2178_v3 = vld [vmem:[%s5740_s4 + $0x10] sm:$0xff] }
 0x190   :  { %3729 = vmatprep.subr.bf16.mxu1 %v6106_v24 }
 0x191   :  { %3951 = vmatpush3.bf16.msra.mxu0 %v3950_v53 }
 0x192   :  { %3953 = vmatprep.subr.bf16.mxu0 %v3952_v62 }
 0x193   :  { %3731 = vmatpush3.bf16.msra.mxu1 %v6111_v34 }
 0x194   :  { %3733 = vmatprep.subr.bf16.mxu1 %v6112_v59 }
 0x195   :  { %3955 = vmatpush3.bf16.msra.mxu0 %v3954_v46 }
 0x196   :  { %3957 = vmatprep.subr.bf16.mxu0 %v3956_v47 }
 0x197   :  { %3735 = vmatpush3.bf16.msra.mxu1 %v6117_v45 }
 0x198   :  { %3737 = vmatprep.subr.bf16.mxu1 %v6118_v25 }
 0x199   :  { %3959 = vmatpush3.bf16.msra.mxu0 %v3958_v43 }
 0x19a   :  { %3961 = vmatprep.subr.bf16.mxu0 %v3960_v31 }
 0x19b   :  { %3739 = vmatpush3.bf16.msra.mxu1 %v6123_v7 }
 0x19c   :  { %3741 = vmatprep.subr.bf16.mxu1 %v6124_v27 }
 0x19d   :  { %3963 = vmatpush3.bf16.msra.mxu0 %v3962_v58 }
 0x19e   :  { %3965 = vmatprep.subr.bf16.mxu0 %v3964_v37  ;;  %v2193_v37 = vand.u32 4294901760, %v2176_v63 }
 0x19f   :  { %3743 = vmatpush3.bf16.msra.mxu1 %v6127_v30 }
 0x1a0   :  { %3777 = vmatprep.subr.bf16.mxu1 %v6080_v50  ;;  %v6136_v50 = vld [vmem:[#allocation63_spill] sm:$0xff] }
 0x1a1   :  { %3967 = vmatpush3.bf16.msra.mxu0 %v3966_v6  ;;  %v2179_v6 = vld [vmem:[%s5740_s4 + $0x18] sm:$0xff] }
 0x1a2   :  { %1025 = vmatmul.mubr.f32.vlgmr.msra.gmra.mrb[14].mxu1 %v6128_v57  ;;  %4000 = vmatprep.subr.bf16.mxu0 %v4305_v36  ;;  %v2202_v57 = vand.u32 4294901760, %v2179_v6 }
 0x1a3   :  { %3779 = vmatpush3.bf16.msra.mxu1 %v6086_v13  ;;  %1295 = vmatprep.mubr.f32.mxu1 %v4918_v23  ;;  %v6129_v23 = vld [vmem:[#allocation91_spill] sm:$0xff]  ;;  %v6137_v13 = vld [vmem:[#allocation64_spill] sm:$0xff] }
 0x1a4   :  { %3781 = vmatprep.subr.bf16.mxu1 %v6088_v40  ;;  %2055 = vmatmul.mubr.f32.vlgmr.msra.gmra.mrb[6].mxu0 %v5110_v8  ;;  %v6138_v40 = vld [vmem:[#allocation72_spill] sm:$0xff] }
 0x1a7   :  { %3783 = vmatpush3.bf16.msra.mxu1 %v6093_v12  ;;  %v6146_v12 = vld [vmem:[#allocation82_spill] sm:$0xff] }
 0x1a8   :  { %3785 = vmatprep.subr.bf16.mxu1 %v6094_v29  ;;  %v6147_v29 = vld [vmem:[#allocation83_spill] sm:$0xff] }
 0x1ab   :  { %3787 = vmatpush3.bf16.msra.mxu1 %v6099_v2  ;;  %v6151_v2 = vld [vmem:[#allocation88_spill] sm:$0xff] }
 0x1ac   :  { %3789 = vmatprep.subr.bf16.mxu1 %v6100_v9  ;;  %v6152_v9 = vld [vmem:[#allocation89_spill] sm:$0xff] }
 0x1af   :  { %3791 = vmatpush3.bf16.msra.mxu1 %v6105_v54 }
 0x1b0   :  { %3793 = vmatprep.subr.bf16.mxu1 %v6106_v24 }
 0x1b3   :  { %3795 = vmatpush3.bf16.msra.mxu1 %v6111_v34 }
 0x1b4   :  { %3797 = vmatprep.subr.bf16.mxu1 %v6112_v59 }
 0x1b7   :  { %3799 = vmatpush3.bf16.msra.mxu1 %v6117_v45 }
 0x1b8   :  { %3801 = vmatprep.subr.bf16.mxu1 %v6118_v25 }
 0x1bb   :  { %3803 = vmatpush3.bf16.msra.mxu1 %v6123_v7  ;;  %v2196_v7 = vand.u32 4294901760, %v2177_v32 }
 0x1bc   :  { %3805 = vmatprep.subr.bf16.mxu1 %v6124_v27 }
 0x1bd   :  { %v5408_v27 = vpack.c.bf16 %v2196_v7, %v2193_v37 }
 0x1bf   :  { %3807 = vmatpush3.bf16.msra.mxu1 %v6127_v30  ;;  %4002 = vmatpush3.bf16.msra.mxu0 %v5408_v27  ;;  %v2199_v30 = vand.u32 4294901760, %v2178_v3 }
 0x1c0   :  { %3841 = vmatprep.subr.bf16.mxu1 %v6129_v23  ;;  %4003 = vmatprep.subr.bf16.mxu0 %v4305_v36 }
 0x1c1   :  { %v5419_v23 = vpack.c.bf16 %v2202_v57, %v2199_v30 }
 0x1c2   :  { %1297 = vmatmul.mubr.f32.vlgmr.msra.gmra.mrb[16].mxu1 %v4910_v4  ;;  %v6135_v4 = vld [vmem:[#allocation62_spill] sm:$0xff] }
 0x1c3   :  { %3843 = vmatpush3.bf16.msra.mxu1 %v6130_v17  ;;  %1639 = vmatprep.mubr.f32.mxu1 %v5116_v61  ;;  %v2180_v17 = vld [vmem:[%s5740_s4 + $0x20] sm:$0xff] }
 0x1c4   :  { %3845 = vmatprep.subr.bf16.mxu1 %v6131_v19  ;;  %v2181_v19 = vld [vmem:[%s5740_s4 + $0x28] sm:$0xff]  ;;  %4005 = vmatpush3.bf16.msra.mxu0 %v5419_v23 }
 0x1c5   :  { %4006 = vmatprep.subr.bf16.mxu0 %v4305_v36 }
 0x1c7   :  { %3847 = vmatpush3.bf16.msra.mxu1 %v6132_v15  ;;  %v2205_v15 = vand.u32 4294901760, %v2180_v17 }
 0x1c8   :  { %3849 = vmatprep.subr.bf16.mxu1 %v6133_v18  ;;  %v2208_v18 = vand.u32 4294901760, %v2181_v19 }
 0x1cb   :  { %3851 = vmatpush3.bf16.msra.mxu1 %v6134_v20  ;;  %v5429_v20 = vpack.c.bf16 %v2208_v18, %v2205_v15 }
 0x1cc   :  { %3853 = vmatprep.subr.bf16.mxu1 %v5080_v11  ;;  %v6139_v11 = vld [vmem:[#allocation74_spill] sm:$0xff] }
 0x1cd   :  { %4008 = vmatpush3.bf16.msra.mxu0 %v5429_v20 }
 0x1ce   :  { %4009 = vmatprep.subr.bf16.mxu0 %v4305_v36 }
 0x1cf   :  { %3855 = vmatpush3.bf16.msra.mxu1 %v5085_v10  ;;  %v6140_v10 = vld [vmem:[#allocation75_spill] sm:$0xff] }
 0x1d0   :  { %3857 = vmatprep.subr.bf16.mxu1 %v5087_v28  ;;  %v6141_v28 = vld [vmem:[#allocation76_spill] sm:$0xff] }
 0x1d3   :  { %3859 = vmatpush3.bf16.msra.mxu1 %v5108_v0  ;;  %v6142_v0 = vld [vmem:[#allocation77_spill] sm:$0xff] }
 0x1d4   :  { %3861 = vmatprep.subr.bf16.mxu1 %v5118_v5  ;;  %v6143_v5 = vld [vmem:[#allocation78_spill] sm:$0xff] }
 0x1d7   :  { %3863 = vmatpush3.bf16.msra.mxu1 %v6135_v4  ;;  %v5431_v4 = vsub.f32 %v2176_v63, %v2193_v37 }
 0x1d8   :  { %3865 = vmatprep.subr.bf16.mxu1 %v6136_v50  ;;  %v5433_v50 = vsub.f32 %v2177_v32, %v2196_v7 }
 0x1d9   :  { %v2286_v7 = vand.u32 4294901760, %v5431_v4 }
 0x1db   :  { %3867 = vmatpush3.bf16.msra.mxu1 %v6137_v13  ;;  %v5435_v13 = vsub.f32 %v2178_v3, %v2199_v30  ;;  %v2293_v3 = vand.u32 4294901760, %v5433_v50 }
 0x1dc   :  { %3869 = vmatprep.subr.bf16.mxu1 %v5167_v44  ;;  %v6144_v44 = vld [vmem:[#allocation79_spill] sm:$0xff] }
 0x1df   :  { %3871 = vmatpush3.bf16.msra.mxu1 %v5172_v26  ;;  %v6145_v26 = vld [vmem:[#allocation80_spill] sm:$0xff] }
 0x1e0   :  { %3905 = vmatprep.subr.bf16.mxu1 %v6138_v40 }
 0x1e2   :  { %1641 = vmatmul.mubr.f32.vlgmr.msra.gmra.mrb[18].mxu1 %v5110_v8 }
 0x1e3   :  { %3907 = vmatpush3.bf16.msra.mxu1 %v6139_v11  ;;  %1883 = vmatprep.mubr.f32.mxu1 %v1400_v49  ;;  %v6150_v49 = vld [vmem:[#allocation87_spill] sm:$0xff] }
 0x1e4   :  { %3909 = vmatprep.subr.bf16.mxu1 %v6140_v10 }
 0x1e7   :  { %3911 = vmatpush3.bf16.msra.mxu1 %v6141_v28 }
 0x1e8   :  { %3913 = vmatprep.subr.bf16.mxu1 %v6142_v0 }
 0x1eb   :  { %3915 = vmatpush3.bf16.msra.mxu1 %v6143_v5 }
 0x1ec   :  { %3917 = vmatprep.subr.bf16.mxu1 %v6144_v44 }
 0x1ef   :  { %3919 = vmatpush3.bf16.msra.mxu1 %v6145_v26 }
 0x1f0   :  { %3921 = vmatprep.subr.bf16.mxu1 %v6146_v12 }
 0x1f3   :  { %3923 = vmatpush3.bf16.msra.mxu1 %v6147_v29 }
 0x1f4   :  { %3925 = vmatprep.subr.bf16.mxu1 %v6148_v51 }
 0x1f7   :  { %3927 = vmatpush3.bf16.msra.mxu1 %v6149_v55 }
 0x1f8   :  { %3929 = vmatprep.subr.bf16.mxu1 %v6150_v49 }
 0x1fb   :  { %3931 = vmatpush3.bf16.msra.mxu1 %v6151_v2 }
 0x1fc   :  { %3933 = vmatprep.subr.bf16.mxu1 %v6152_v9 }
 0x1ff   :  { %3935 = vmatpush3.bf16.msra.mxu1 %v6153_v35 }
 0x200   :  { %3969 = vmatprep.subr.bf16.mxu1 %v6138_v40  ;;  %v5437_v40 = vsub.f32 %v2179_v6, %v2202_v57  ;;  %v2294_v6 = vsub.f32 %v5433_v50, %v2293_v3  ;;  %v2300_v57 = vand.u32 4294901760, %v5435_v13 }
 0x202   :  { %1887 = vmatmul.mubr.f32.vlgmr.msra.gmra.mrb[20].mxu1 %v6154_v48  ;;  %v2189_v48 = vld [vmem:[%s5740_s4 + $0x68] sm:$0xff]  ;;  %v2295_v30 = vand.u32 4294901760, %v2294_v6 }
 0x203   :  { %3971 = vmatpush3.bf16.msra.mxu1 %v6139_v11  ;;  %2157 = vmatprep.mubr.f32.mxu1 %v5116_v61  ;;  %v2182_v11 = vld [vmem:[%s5740_s4 + $0x30] sm:$0xff] }
 0x204   :  { %3973 = vmatprep.subr.bf16.mxu1 %v6140_v10  ;;  %v2183_v10 = vld [vmem:[%s5740_s4 + $0x38] sm:$0xff] }
 0x207   :  { %3975 = vmatpush3.bf16.msra.mxu1 %v6141_v28  ;;  %v2184_v28 = vld [vmem:[%s5740_s4 + $0x40] sm:$0xff] }
 0x208   :  { %3977 = vmatprep.subr.bf16.mxu1 %v6142_v0  ;;  %v5449_v0 = vsub.f32 %v2180_v17, %v2205_v15  ;;  %v2307_v17 = vand.u32 4294901760, %v5437_v40  ;;  %v2301_v15 = vsub.f32 %v5435_v13, %v2300_v57 }
 0x20b   :  { %3979 = vmatpush3.bf16.msra.mxu1 %v6143_v5  ;;  %v5451_v5 = vsub.f32 %v2181_v19, %v2208_v18  ;;  %v2308_v18 = vsub.f32 %v5437_v40, %v2307_v17 }
 0x20c   :  { %3981 = vmatprep.subr.bf16.mxu1 %v6144_v44  ;;  %v3056_v53 = vpop.f32.mrb[0].mxu0  ;;  %v2211_v44 = vand.u32 4294901760, %v2182_v11 }
 0x20d   :  { %v3057_v22 = vpop.f32.mrb[1].mxu0 }
 0x20e   :  { %v3058_v21 = vadd.f32 %v3057_v22, %v3056_v53  ;;  %v5471_v22 = vsub.f32 %v2182_v11, %v2211_v44  ;;  %v2302_v11 = vand.u32 4294901760, %v2301_v15 }
 0x20f   :  { %3983 = vmatpush3.bf16.msra.mxu1 %v6145_v26  ;;  %v2214_v26 = vand.u32 4294901760, %v2183_v10 }
 0x210   :  { %3985 = vmatprep.subr.bf16.mxu1 %v6146_v12  ;;  %v2185_v12 = vld [vmem:[%s5740_s4 + $0x48] sm:$0xff] }
 0x211   :  { %v5469_v53 = vpack.c.bf16 %v2214_v26, %v2211_v44  ;;  %v2321_v44 = vand.u32 4294901760, %v5451_v5 }
 0x213   :  { %3987 = vmatpush3.bf16.msra.mxu1 %v6147_v29  ;;  %v2186_v29 = vld [vmem:[%s5740_s4 + $0x50] sm:$0xff]  ;;  %4011 = vmatpush3.bf16.msra.mxu0 %v5469_v53 }
 0x214   :  { %3989 = vmatprep.subr.bf16.mxu1 %v6148_v51  ;;  %v2916_v61 = vpop.f32.mrb[8].mxu1  ;;  %v2187_v51 = vld [vmem:[%s5740_s4 + $0x58] sm:$0xff]  ;;  %4012 = vmatprep.subr.bf16.mxu0 %v4305_v36 }
 0x215   :  { %v2917_v60 = vpop.f32.mrb[9].mxu1 }
 0x216   :  { %v2918_v62 = vadd.f32 %v2917_v60, %v2916_v61  ;;  %v2190_v60 = vld [vmem:[%s5740_s4 + $0x70] sm:$0xff] }
 0x217   :  { %3991 = vmatpush3.bf16.msra.mxu1 %v6149_v55  ;;  %v2217_v55 = vand.u32 4294901760, %v2184_v28 }
 0x218   :  { %3993 = vmatprep.subr.bf16.mxu1 %v6150_v49  ;;  %v2220_v49 = vand.u32 4294901760, %v2185_v12 }
 0x21b   :  { %3995 = vmatpush3.bf16.msra.mxu1 %v6151_v2  ;;  %v2223_v2 = vand.u32 4294901760, %v2186_v29 }
 0x21c   :  { %3997 = vmatprep.subr.bf16.mxu1 %v6152_v9  ;;  %v2226_v9 = vand.u32 4294901760, %v2187_v51 }
 0x21f   :  { %3999 = vmatpush3.bf16.msra.mxu1 %v6153_v35  ;;  %v2188_v35 = vld [vmem:[%s5740_s4 + $0x60] sm:$0xff] }
 0x220   :  { %v2229_v61 = vand.u32 4294901760, %v2188_v35 }
 0x222   :  { %2159 = vmatmul.mubr.f32.vlgmr.msra.gmra.mrb[22].mxu1 %v5110_v8 }
 0x235   :  { %v2951_v54 = vpop.f32.mrb[10].mxu1 }
 0x236   :  { %v2952_v42 = vpop.f32.mrb[11].mxu1 }
 0x237   :  { %v3126_v24 = vpop.f32.mrb[2].mxu0  ;;  %v2953_v46 = vadd.f32 %v2952_v42, %v2951_v54  ;;  %v5481_v54 = vpack.c.bf16 %v2220_v49, %v2217_v55  ;;  %v5485_v42 = vsub.f32 %v2185_v12, %v2220_v49  ;;  %v5878_v49 = vand.u32 4294901760, %v5471_v22 }
 0x238   :  { %v3127_v38 = vpop.f32.mrb[3].mxu0 }
 0x239   :  { %v5394_v33 = vadd.f32 %v3127_v38, %v3126_v24  ;;  %v781_v56 = vadd.f32 %v2953_v46, %v2918_v62  ;;  %v2191_v62 = vld [vmem:[%s5740_s4 + $0x78] sm:$0xff]  ;;  %v5483_v24 = vsub.f32 %v2184_v28, %v2217_v55  ;;  %v5488_v38 = vsub.f32 %v2186_v29, %v2223_v2  ;;  %4014 = vmatpush3.bf16.msra.mxu0 %v5481_v54 }
 0x23a   :  { %v5490_v46 = vsub.f32 %v2187_v51, %v2226_v9  ;;  %4015 = vmatprep.subr.bf16.mxu0 %v4305_v36  ;;  %v2314_v28 = vand.u32 4294901760, %v5449_v0  ;;  %v2322_v29 = vsub.f32 %v5451_v5, %v2321_v44 }
 0x23c   :  { %v2315_v12 = vsub.f32 %v5449_v0, %v2314_v28  ;;  %v2323_v55 = vand.u32 4294901760, %v2322_v29 }
 0x23e   :  { %v2316_v51 = vand.u32 4294901760, %v2315_v12 }
 0x255   :  { %v2986_v47 = vpop.f32.mrb[12].mxu1 }
 0x256   :  { %v2987_v34 = vpop.f32.mrb[13].mxu1 }
 0x257   :  { %v2988_v59 = vadd.f32 %v2987_v34, %v2986_v47  ;;  %v3196_v41 = vpop.f32.mrb[4].mxu0  ;;  %v5492_v47 = vsub.f32 %v2188_v35, %v2229_v61  ;;  %v2235_v34 = vand.u32 4294901760, %v2190_v60  ;;  %v2329_v35 = vsub.f32 %v5471_v22, %v5878_v49 }
 0x258   :  { %v3197_v16 = vpop.f32.mrb[5].mxu0 }
 0x259   :  { %v919_v43 = vadd.f32 %v2988_v59, %v781_v56  ;;  %v5396_v52 = vadd.f32 %v3197_v16, %v3196_v41  ;;  %v2232_v56 = vand.u32 4294901760, %v2189_v48  ;;  %v2238_v59 = vand.u32 4294901760, %v2191_v62 }
 0x25a   :  { %v4307_v16 = vmov 0.0   ;;  %v5872_v12 = vand.u32 4294901760, %v5492_v47 }
 0x25b   :  { %v5495_v41 = vsub.f32 %v2189_v48, %v2232_v56  ;;  %3438 = vmatprep.mubr.msk.f32.mxu0 %vm4306_vm0, %v4307_v16  ;;  %v5509_v63 = vpack.c.bf16 %v2232_v56, %v2229_v61  ;;  %v5514_v37 = vpack.c.bf16 %v2238_v59, %v2235_v34  ;;  %v2330_v61 = vand.u32 4294901760, %v2329_v35 }
 0x25c   :  { %v5875_v56 = vand.u32 4294901760, %v5485_v42  ;;  %v2371_v35 = vsub.f32 %v5492_v47, %v5872_v12 }
 0x25d   :  { %v5871_v29 = vand.u32 4294901760, %v5495_v41 }
 0x275   :  { %v3021_v14 = vpop.f32.mrb[14].mxu1 }
 0x276   :  { %v3022_v31 = vpop.f32.mrb[15].mxu1 }
 0x277   :  { %v3023_v45 = vadd.f32 %v3022_v31, %v3021_v14  ;;  %v3266_v8 = vpop.f32.mrb[6].mxu0  ;;  %v5501_v14 = vsub.f32 %v2191_v62, %v2238_v59  ;;  %v5876_v62 = vand.u32 4294901760, %v5483_v24 }
 0x278   :  { %v3267_v25 = vpop.f32.mrb[7].mxu0 }
 0x279   :  { %v1027_v39 = vadd.f32 %v3023_v45, %v919_v43  ;;  %v5398_v1 = vadd.f32 %v3267_v25, %v3266_v8  ;;  %v5499_v43 = vsub.f32 %v2190_v60, %v2235_v34  ;;  %v5504_v45 = vpack.c.bf16 %v2226_v9, %v2223_v2 }
 0x27a   :  { %v5549_v9 = vpack.c.bf16 %v2323_v55, %v2316_v51  ;;  %v2343_v59 = vsub.f32 %v5483_v24, %v5876_v62 }
 0x27b   :  { %v5400_v58 = vadd.f32 %v3058_v21, %v1027_v39  ;;  %v5473_v21 = vsub.f32 %v2183_v10, %v2214_v26  ;;  %4017 = vmatpush3.bf16.msra.mxu0 %v5504_v45  ;;  %v2309_v10 = vand.u32 4294901760, %v2308_v18 }
 0x27c   :  { %4018 = vmatprep.subr.bf16.mxu0 %v4305_v36 }
 0x27d   :  { %v5539_v26 = vpack.c.bf16 %v2309_v10, %v2302_v11  ;;  %v5877_v2 = vand.u32 4294901760, %v5473_v21 }
 0x27f   :  { %4020 = vmatpush3.bf16.msra.mxu0 %v5509_v63  ;;  %v2336_v48 = vsub.f32 %v5473_v21, %v5877_v2 }
 0x280   :  { %4021 = vmatprep.subr.bf16.mxu0 %v4305_v36 }
 0x281   :  { %v2337_v60 = vand.u32 4294901760, %v2336_v48  ;;  %v2378_v48 = vsub.f32 %v5495_v41, %v5871_v29 }
 0x283   :  { %4023 = vmatpush3.bf16.msra.mxu0 %v5514_v37  ;;  %v5559_v34 = vpack.c.bf16 %v2337_v60, %v2330_v61  ;;  %v2372_v60 = vand.u32 4294901760, %v2371_v35  ;;  %v4058_v35 = vpack.c.bf16 %v5473_v21, %v5471_v22 }
 0x284   :  { %4024 = vmatprep.subr.bf16.mxu0 %v4305_v36 }
 0x295   :  { %v3091_v31 = vpop.f32.mrb[16].mxu1 }
 0x296   :  { %v3092_v8 = vpop.f32.mrb[17].mxu1 }
 0x297   :  { %v3093_v25 = vadd.f32 %v3092_v8, %v3091_v31  ;;  %v2350_v31 = vsub.f32 %v5485_v42, %v5875_v56  ;;  %v2344_v8 = vand.u32 4294901760, %v2343_v59  ;;  %v2379_v59 = vand.u32 4294901760, %v2378_v48 }
 0x298   :  { %v4061_v48 = vpack.c.bf16 %v5485_v42, %v5483_v24 }
 0x299   :  { %v1299_v39 = vadd.f32 %v3093_v25, %v5400_v58  ;;  %v2287_v58 = vsub.f32 %v5431_v4, %v2286_v7  ;;  %v2351_v25 = vand.u32 4294901760, %v2350_v31  ;;  %v5870_v31 = vand.u32 4294901760, %v5499_v43 }
 0x29b   :  { %v1411_v32 = vadd.f32 %v5394_v33, %v1299_v39  ;;  %v2288_v33 = vand.u32 4294901760, %v2287_v58  ;;  %v5874_v39 = vand.u32 4294901760, %v5488_v38  ;;  %v5873_v58 = vand.u32 4294901760, %v5490_v46 }
 0x29c   :  { %v5569_v6 = vpack.c.bf16 %v2351_v25, %v2344_v8  ;;  %v5869_v8 = vand.u32 4294901760, %v5501_v14 }
 0x29d   :  { %v5529_v19 = vpack.c.bf16 %v2295_v30, %v2288_v33  ;;  %v2357_v33 = vsub.f32 %v5488_v38, %v5874_v39  ;;  %v2364_v30 = vsub.f32 %v5490_v46, %v5873_v58 }
 0x29f   :  { %v2358_v11 = vand.u32 4294901760, %v2357_v33  ;;  %v2365_v10 = vand.u32 4294901760, %v2364_v30  ;;  %v4043_v33 = vpack.c.bf16 %v2379_v59, %v2372_v60  ;;  %v2385_v30 = vsub.f32 %v5499_v43, %v5870_v31 }
 0x2a1   :  { %v4040_v55 = vpack.c.bf16 %v2365_v10, %v2358_v11  ;;  %v4049_v10 = vpack.c.bf16 %v5433_v50, %v5431_v4  ;;  %v4103_v4 = vpack.c.bf16 %v2321_v44, %v2314_v28  ;;  %v6157_v50 = vand.u32 4294901760, %v5471_v22 }
 0x2a2   :  { %v6163_v22 = vand.u32 4294901760, %v5492_v47 }
 0x2b5   :  { %v3161_v15 = vpop.f32.mrb[18].mxu1 }
 0x2b6   :  { %v3162_v18 = vpop.f32.mrb[19].mxu1 }
 0x2b7   :  { %v3163_v51 = vadd.f32 %v3162_v18, %v3161_v15  ;;  %v2392_v15 = vsub.f32 %v5501_v14, %v5869_v8  ;;  %v2386_v18 = vand.u32 4294901760, %v2385_v30  ;;  %v4064_v30 = vpack.c.bf16 %v5490_v46, %v5488_v38 }
 0x2b8   :  { %v4070_v8 = vpack.c.bf16 %v5501_v14, %v5499_v43 }
 0x2b9   :  { %v1643_v61 = vadd.f32 %v3163_v51, %v1411_v32  ;;  %v2393_v11 = vand.u32 4294901760, %v2392_v15  ;;  %v4052_v51 = vpack.c.bf16 %v5437_v40, %v5435_v13  ;;  %v6158_v13 = vand.u32 4294901760, %v5473_v21 }
 0x2ba   :  { %v6164_v21 = vand.u32 4294901760, %v5495_v41 }
 0x2bb   :  { %v1781_v25 = vadd.f32 %v5396_v52, %v1643_v61  ;;  %v4046_v32 = vpack.c.bf16 %v2393_v11, %v2386_v18  ;;  %v4055_v52 = vpack.c.bf16 %v5451_v5, %v5449_v0  ;;  %v4067_v11 = vpack.c.bf16 %v5495_v41, %v5492_v47 }
 0x2bc   :  { %v4106_v40 = vpack.c.bf16 %v6158_v13, %v6157_v50  ;;  %v6161_v0 = vand.u32 4294901760, %v5488_v38  ;;  %v6162_v5 = vand.u32 4294901760, %v5490_v46  ;;  %v4115_v28 = vpack.c.bf16 %v6164_v21, %v6163_v22 }
 0x2d5   :  { %v3231_v61 = vpop.f32.mrb[20].mxu1 }
 0x2d6   :  { %v3232_v60 = vpop.f32.mrb[21].mxu1 }
 0x2d7   :  { %v3233_v59 = vadd.f32 %v3232_v60, %v3231_v61 }
 0x2d9   :  { %v1889_v15 = vadd.f32 %v3233_v59, %v1781_v25  ;;  %v6155_v25 = vld [vmem:[#allocation73_spill] sm:$0xff] }
 0x2da   :  { %v6156_v59 = vsub.s32 0, %v6155_v25 }
 0x2db   :  { %v2057_v18 = vadd.f32 %v5398_v1, %v1889_v15  ;;  %v4225_v15 = vld [vmem:[%s5736_s0] sm:$0xff]  ;;  %s4308_s0 = smov [#allocation7]  }
 0x2dc   :  { %s2841_s27 = sshll.u32 %s4308_s0, 4  ;;  %s2842_s27 = int_to_ptr.vmem [resolvable:$true] %s2841_s27 }
 0x2dd   :  { %s4270_s28 = scalar_lea.vmem %s2842_s27, 128  ;;  %p4275_p3 = scmp.lt.s32.totalorder %s2842_s27, %s2842_s27 }
 0x2de   :  { %p4271_p2 = scmp.ne.s32.totalorder %s2842_s27, %s4270_s28  ;;  %p4276_p4 = scmp.lt.s32.totalorder %s4270_s28, %s4270_s28 }
 0x2e0   :  { %p4277_p5 = por %p4276_p4, %p4275_p3 }
 0x2e2   :  { %p4278_p6 = pnand %p4277_p5, %p4271_p2 }
 0x2f5   :  { %v3301_v31 = vpop.f32.mrb[22].mxu1 }
 0x2f6   :  { %v3302_v29 = vpop.f32.mrb[23].mxu1 }
 0x2f7   :  { %v3303_v12 = vadd.f32 %v3302_v29, %v3301_v31 }
 0x2f9   :  { %v2161_v58 = vadd.f32 %v3303_v12, %v2057_v18 }
 0x2fb   :  { %v2883_v39 = vmul.f32 -0.125, %v2161_v58 }
 0x2fd   :  { %v2166_v56 = vmul.f32 1.442695, %v2883_v39 }
 0x2ff   :  { %4221 = vpow2.f32 %v2166_v56 }
 0x309   :  { %v4222_v61 = vpop.eup %4221 }
 0x30a   :  { %v2168_v60 = vadd.f32 1.0, %v4222_v61 }
 0x30c   :  { %4223 = vrcp.f32 %v2168_v60 }
 0x316   :  { %v4224_v62 = vpop.eup %4223 }
 0x317   :  { %v2174_v1 = vrot.slane %v4224_v62, %v6156_v59 }
 0x319   :  { %v2175_v2 = vmul.f32 %v4225_v15, %v2174_v1 }
 0x31b   :  { %v5616_v49 = vand.u32 4294901760, %v2175_v2 }
 0x31d   :  { %v2274_v29 = vsub.f32 %v2175_v2, %v5616_v49 }
 0x31f   :  { %v2275_v12 = vand.u32 4294901760, %v2274_v29 }
 0x321   :  { %v2276_v58 = vsub.f32 %v2274_v29, %v2275_v12 }
 0x323   :  { %v2277_v39 = vand.u32 4294901760, %v2276_v58 }
 0x325   :  { %3439 = vmatmul.mubr.f32.vlgmr.msra.gmra.mrb[8].mxu0 %v2277_v39 }
 0x326   :  { %4026 = vmatpush3.bf16.msra.mxu0 %v5529_v19  ;;  %3473 = vmatprep.mubr.msk.f32.mxu0 %vm4306_vm0, %v4307_v16  ;;  %v4097_v19 = vpack.c.bf16 %v2293_v3, %v2286_v7  ;;  %v6159_v7 = vand.u32 4294901760, %v5483_v24  ;;  %v6160_v3 = vand.u32 4294901760, %v5485_v42  ;;  %v6165_v24 = vand.u32 4294901760, %v5499_v43 }
 0x327   :  { %4027 = vmatprep.subr.bf16.mxu0 %v4305_v36  ;;  %v6166_v42 = vand.u32 4294901760, %v5501_v14 }
 0x329   :  { %v4118_v44 = vpack.c.bf16 %v6166_v42, %v6165_v24 }
 0x32a   :  { %4029 = vmatpush3.bf16.msra.mxu0 %v5539_v26  ;;  %v4100_v26 = vpack.c.bf16 %v2307_v17, %v2300_v57  ;;  %v4109_v57 = vpack.c.bf16 %v6160_v3, %v6159_v7  ;;  %v4112_v17 = vpack.c.bf16 %v6162_v5, %v6161_v0 }
 0x32b   :  { %4030 = vmatprep.subr.bf16.mxu0 %v4305_v36 }
 0x32e   :  { %4032 = vmatpush3.bf16.msra.mxu0 %v5549_v9 }
 0x32f   :  { %4033 = vmatprep.subr.bf16.mxu0 %v4305_v36 }
 0x332   :  { %4035 = vmatpush3.bf16.msra.mxu0 %v5559_v34 }
 0x333   :  { %4036 = vmatprep.subr.bf16.mxu0 %v4305_v36 }
 0x336   :  { %4038 = vmatpush3.bf16.msra.mxu0 %v5569_v6 }
 0x337   :  { %4039 = vmatprep.subr.bf16.mxu0 %v4305_v36 }
 0x33a   :  { %4041 = vmatpush3.bf16.msra.mxu0 %v4040_v55 }
 0x33b   :  { %4042 = vmatprep.subr.bf16.mxu0 %v4305_v36 }
 0x33e   :  { %4044 = vmatpush3.bf16.msra.mxu0 %v4043_v33 }
 0x33f   :  { %4045 = vmatprep.subr.bf16.mxu0 %v4305_v36 }
 0x342   :  { %4047 = vmatpush3.bf16.msra.mxu0 %v4046_v32 }
 0x343   :  { %4048 = vmatprep.subr.bf16.mxu0 %v4305_v36 }
 0x345   :  { %3474 = vmatmul.mubr.f32.vlgmr.msra.gmra.mrb[8].mxu0 %v5616_v49 }
 0x346   :  { %4050 = vmatpush3.bf16.msra.mxu0 %v4049_v10  ;;  %3508 = vmatprep.mubr.msk.f32.mxu0 %vm4306_vm0, %v4307_v16 }
 0x347   :  { %4051 = vmatprep.subr.bf16.mxu0 %v4305_v36 }
 0x34a   :  { %4053 = vmatpush3.bf16.msra.mxu0 %v4052_v51 }
 0x34b   :  { %4054 = vmatprep.subr.bf16.mxu0 %v4305_v36 }
 0x34e   :  { %4056 = vmatpush3.bf16.msra.mxu0 %v4055_v52 }
 0x34f   :  { %4057 = vmatprep.subr.bf16.mxu0 %v4305_v36 }
 0x352   :  { %4059 = vmatpush3.bf16.msra.mxu0 %v4058_v35 }
 0x353   :  { %4060 = vmatprep.subr.bf16.mxu0 %v4305_v36 }
 0x356   :  { %4062 = vmatpush3.bf16.msra.mxu0 %v4061_v48 }
 0x357   :  { %4063 = vmatprep.subr.bf16.mxu0 %v4305_v36 }
 0x35a   :  { %4065 = vmatpush3.bf16.msra.mxu0 %v4064_v30 }
 0x35b   :  { %4066 = vmatprep.subr.bf16.mxu0 %v4305_v36 }
 0x35e   :  { %4068 = vmatpush3.bf16.msra.mxu0 %v4067_v11 }
 0x35f   :  { %4069 = vmatprep.subr.bf16.mxu0 %v4305_v36 }
 0x362   :  { %4071 = vmatpush3.bf16.msra.mxu0 %v4070_v8 }
 0x363   :  { %4072 = vmatprep.subr.bf16.mxu0 %v4305_v36 }
 0x365   :  { %3509 = vmatmul.mubr.f32.vlgmr.msra.gmra.mrb[8].mxu0 %v2274_v29 }
 0x366   :  { %4074 = vmatpush3.bf16.msra.mxu0 %v5408_v27  ;;  %3543 = vmatprep.mubr.msk.f32.mxu0 %vm4306_vm0, %v4307_v16 }
 0x367   :  { %4075 = vmatprep.subr.bf16.mxu0 %v4305_v36 }
 0x36a   :  { %4077 = vmatpush3.bf16.msra.mxu0 %v5419_v23 }
 0x36b   :  { %4078 = vmatprep.subr.bf16.mxu0 %v4305_v36 }
 0x36e   :  { %4080 = vmatpush3.bf16.msra.mxu0 %v5429_v20 }
 0x36f   :  { %4081 = vmatprep.subr.bf16.mxu0 %v4305_v36 }
 0x372   :  { %4083 = vmatpush3.bf16.msra.mxu0 %v5469_v53 }
 0x373   :  { %4084 = vmatprep.subr.bf16.mxu0 %v4305_v36 }
 0x376   :  { %4086 = vmatpush3.bf16.msra.mxu0 %v5481_v54 }
 0x377   :  { %4087 = vmatprep.subr.bf16.mxu0 %v4305_v36 }
 0x37a   :  { %4089 = vmatpush3.bf16.msra.mxu0 %v5504_v45 }
 0x37b   :  { %4090 = vmatprep.subr.bf16.mxu0 %v4305_v36 }
 0x37e   :  { %4092 = vmatpush3.bf16.msra.mxu0 %v5509_v63 }
 0x37f   :  { %4093 = vmatprep.subr.bf16.mxu0 %v4305_v36 }
 0x382   :  { %4095 = vmatpush3.bf16.msra.mxu0 %v5514_v37 }
 0x383   :  { %4096 = vmatprep.subr.bf16.mxu0 %v4305_v36 }
 0x385   :  { %3544 = vmatmul.mubr.f32.vlgmr.msra.gmra.mrb[8].mxu0 %v2275_v12 }
 0x386   :  { %4098 = vmatpush3.bf16.msra.mxu0 %v4097_v19  ;;  %3578 = vmatprep.mubr.msk.f32.mxu0 %vm4306_vm0, %v4307_v16 }
 0x387   :  { %4099 = vmatprep.subr.bf16.mxu0 %v4305_v36 }
 0x38a   :  { %4101 = vmatpush3.bf16.msra.mxu0 %v4100_v26 }
 0x38b   :  { %4102 = vmatprep.subr.bf16.mxu0 %v4305_v36 }
 0x38e   :  { %4104 = vmatpush3.bf16.msra.mxu0 %v4103_v4 }
 0x38f   :  { %4105 = vmatprep.subr.bf16.mxu0 %v4305_v36 }
 0x392   :  { %4107 = vmatpush3.bf16.msra.mxu0 %v4106_v40 }
 0x393   :  { %4108 = vmatprep.subr.bf16.mxu0 %v4305_v36 }
 0x396   :  { %4110 = vmatpush3.bf16.msra.mxu0 %v4109_v57 }
 0x397   :  { %4111 = vmatprep.subr.bf16.mxu0 %v4305_v36 }
 0x39a   :  { %4113 = vmatpush3.bf16.msra.mxu0 %v4112_v17 }
 0x39b   :  { %4114 = vmatprep.subr.bf16.mxu0 %v4305_v36 }
 0x39e   :  { %4116 = vmatpush3.bf16.msra.mxu0 %v4115_v28 }
 0x39f   :  { %4117 = vmatprep.subr.bf16.mxu0 %v4305_v36 }
 0x3a2   :  { %4119 = vmatpush3.bf16.msra.mxu0 %v4118_v44 }
 0x3a3   :  { %4120 = vmatprep.subr.bf16.mxu0 %v4305_v36 }
 0x3a5   :  { %3579 = vmatmul.mubr.f32.vlgmr.msra.gmra.mrb[8].mxu0 %v5616_v49 }
 0x3a6   :  { %4122 = vmatpush3.bf16.msra.mxu0 %v5408_v27  ;;  %3613 = vmatprep.mubr.msk.f32.mxu0 %vm4306_vm0, %v4307_v16 }
 0x3a7   :  { %4123 = vmatprep.subr.bf16.mxu0 %v4305_v36 }
 0x3aa   :  { %4125 = vmatpush3.bf16.msra.mxu0 %v5419_v23 }
 0x3ab   :  { %4126 = vmatprep.subr.bf16.mxu0 %v4305_v36 }
 0x3ae   :  { %4128 = vmatpush3.bf16.msra.mxu0 %v5429_v20 }
 0x3af   :  { %4129 = vmatprep.subr.bf16.mxu0 %v4305_v36 }
 0x3b2   :  { %4131 = vmatpush3.bf16.msra.mxu0 %v5469_v53 }
 0x3b3   :  { %4132 = vmatprep.subr.bf16.mxu0 %v4305_v36 }
 0x3b6   :  { %4134 = vmatpush3.bf16.msra.mxu0 %v5481_v54 }
 0x3b7   :  { %4135 = vmatprep.subr.bf16.mxu0 %v4305_v36 }
 0x3ba   :  { %4137 = vmatpush3.bf16.msra.mxu0 %v5504_v45 }
 0x3bb   :  { %4138 = vmatprep.subr.bf16.mxu0 %v4305_v36 }
 0x3be   :  { %4140 = vmatpush3.bf16.msra.mxu0 %v5509_v63 }
 0x3bf   :  { %4141 = vmatprep.subr.bf16.mxu0 %v4305_v36 }
 0x3c2   :  { %4143 = vmatpush3.bf16.msra.mxu0 %v5514_v37 }
 0x3c5   :  { %3614 = vmatmul.mubr.f32.vlgmr.msra.gmra.mrb[8].mxu0 %v5616_v49 }
 0x498   :  { %v2829_v27 = vpop.f32.mrb[8].mxu0 }
 0x499   :  { %v3615_v23 = vpop.f32.mrb[9].mxu0  ;;  %2834 = vst.msk [vmem:[#allocation7] sm:$0xff] %vm2833_vm1, %v2829_v27 }
 0x49a   :  { %4281 = shalt.err (!%p4278_p6)
}
 0x49b   :  { %s4282_s6 = scalar_lea.hbm %s5741_s5, 128 }
 0x49c   :  { %p4283_p7 = scmp.ne.s32.totalorder %s5741_s5, %s4282_s6  ;;  %p4286_p8 = scmp.lt.u32.totalorder %s4282_s6, %s5741_s5 }
 0x49e   :  { %p4288_p9 = pnand %p4286_p8, %p4283_p7 }
 0x4a0   :  { %4291 = shalt.err (!%p4288_p9)
}
 0x4a1   :  { %2844 = dma.vmem_to_hbm [thread:$0]  %s2842_s27, 128, %s5741_s5, [#allocation4]  }
 0x4a2   :  { %4296 = dma.done.wait [#allocation4], 128  }
 0x4a3   :  { %4297 = vsyncadd [#allocation4], 4294967168 }
 0x4a4   :  { %2848 = vsyncpa [#allocation3], 1 }
 0x4a5   :  { %2849 = vsyncpa [#allocation6], 1 }
 0x4a6   :  { %2850 = vsyncpa [#allocation4], 1 }

</bundles_post_ra>
